<compile_context>
chip_gen: v7x
topology: tpu7x:2x2x1
jax: 0.10.0
libtpu: 0.0.40
codegen_flags: <defaults>
</compile_context>

<pallas_src>
import functools

import jax
import jax.numpy as jnp
from jax import lax
from jax.experimental import pallas as pl
from jax.experimental.pallas import tpu as pltpu


# ----------------------------------------------------------------------------
# Fused Pallas kernel
# ----------------------------------------------------------------------------
def _cell(gates, c, H):
    """LSTM cell update; gate columns repacked host-side to [i, f, o, g]."""
    sig = jax.nn.sigmoid(gates[:, 0:3 * H])          # one contiguous EUP span
    g = jnp.tanh(gates[:, 3 * H:4 * H])
    i = sig[:, 0:H]
    f = sig[:, H:2 * H]
    o = sig[:, 2 * H:3 * H]
    c_new = f * c + i * g
    h_new = o * jnp.tanh(c_new)
    return h_new, c_new


def _bilstm_layer(gx_ref, whh_f, whh_b, *, T, BP, H, out_scr=None):
    """Fused fwd+bwd recurrence over precomputed input projections.

    gx_ref  : (T*BP, 8H) f32 VMEM scratch.  Rows [t*BP, (t+1)*BP) hold the
              projections for sequence position t:
                cols [0, 4H)   fwd  x_t @ W_ih_f + b_f   (gate order i,f,o,g)
                cols [4H, 8H)  bwd  x_t @ W_ih_b + b_b
    whh_f/b : (H, 4H) bf16 recurrent weights per direction.
    out_scr : optional (T*BP, 2H) f32 VMEM ref receiving the bidirectional
              layer output in sequence order (fwd in cols 0:H, bwd in H:2H).
    Returns (h_fwd at t=T-1, h_bwd at sequence position T-1).
    """
    G = 4 * H
    bf16 = jnp.bfloat16
    zeros = jnp.zeros((BP, H), jnp.float32)
    h_f, c_f, h_b, c_b = zeros, zeros, zeros, zeros
    h_b_last_pos = zeros

    # T is small & static: Python loop fully unrolls with aligned static slices.
    for t in range(T):
        rf = t * BP                 # fwd reads sequence position t
        rb = (T - 1 - t) * BP       # bwd reads sequence position T-1-t
        gx_f = gx_ref[rf:rf + BP, 0:G]
        gx_b = gx_ref[rb:rb + BP, G:2 * G]
        if t == 0:
            g_f, g_b = gx_f, gx_b   # h == 0: recurrent term is zero
        else:
            g_f = gx_f + jnp.dot(h_f.astype(bf16), whh_f,
                                 preferred_element_type=jnp.float32)
            g_b = gx_b + jnp.dot(h_b.astype(bf16), whh_b,
                                 preferred_element_type=jnp.float32)
        h_f, c_f = _cell(g_f, c_f, H)
        h_b, c_b = _cell(g_b, c_b, H)

        if out_scr is not None:
            out_scr[rf:rf + BP, 0:H] = h_f
            out_scr[rb:rb + BP, H:2 * H] = h_b
        if t == 0:
            h_b_last_pos = h_b      # bwd hidden at sequence position T-1
    return h_f, h_b_last_pos


def _blstm_kernel(x_ref, wih0_ref, whh0f_ref, whh0b_ref, b0_ref,
                  wih1_ref, whh1f_ref, whh1b_ref, b1_ref,
                  wlin_ref, blin_ref, out_ref, gx_scr, out0_scr, *, T, BP, H):
    bf16 = jnp.bfloat16

    # ---- Layer 0: hoisted input projection (bf16 MXU, f32 accumulate) ----
    gx_scr[...] = (jnp.dot(x_ref[...], wih0_ref[...],
                           preferred_element_type=jnp.float32) + b0_ref[...])
    _bilstm_layer(gx_scr, whh0f_ref[...], whh0b_ref[...],
                  T=T, BP=BP, H=H, out_scr=out0_scr)

    # ---- Layer 1: projection of the full layer-0 output (one matmul) ----
    gx_scr[...] = (jnp.dot(out0_scr[...].astype(bf16), wih1_ref[...],
                           preferred_element_type=jnp.float32) + b1_ref[...])
    h_f, h_b = _bilstm_layer(gx_scr, whh1f_ref[...], whh1b_ref[...],
                             T=T, BP=BP, H=H, out_scr=None)

    # out[:, -1, :] == [fwd final hidden | bwd hidden at position T-1].
    # nn.Dropout(p=0.1) is identity at inference time.
    out_last = jnp.concatenate([h_f, h_b], axis=1).astype(bf16)   # (BP, 2H)
    out_ref[...] = (jnp.dot(out_last, wlin_ref[...],
                            preferred_element_type=jnp.float32) + blin_ref[...])


# ----------------------------------------------------------------------------
# Wrapper
# ----------------------------------------------------------------------------
def blstm_forward(packed, x):
    """x: (B, T, input_size), batch_first — matches the PyTorch module."""
    B, T, D = x.shape
    (wih0, whh0f, whh0b, b0), (wih1, whh1f, whh1b, b1) = packed["layers"]
    H = whh0f.shape[0]
    OUT = packed["w_lin"].shape[1]
    BP = ((B + 7) // 8) * 8       # sublane-aligned row count (pad rows = 0)

    x_t = jnp.transpose(x, (1, 0, 2))                         # (T, B, D)
    x_pad = jnp.zeros((T, BP, D), jnp.float32).at[:, :B, :].set(x_t)
    x_flat = x_pad.reshape(T * BP, D).astype(jnp.bfloat16)    # time-major, flat

    kernel = functools.partial(_blstm_kernel, T=T, BP=BP, H=H)
    y = pl.pallas_call(
        kernel,
        out_shape=jax.ShapeDtypeStruct((BP, OUT), jnp.float32),
        scratch_shapes=[
            pltpu.VMEM((T * BP, 8 * H), jnp.float32),   # gx (reused per layer)
            pltpu.VMEM((T * BP, 2 * H), jnp.float32),   # layer-0 output
        ],
    )(x_flat, wih0, whh0f, whh0b, b0, wih1, whh1f, whh1b, b1,
      packed["w_lin"], packed["b_lin"])
    return y[:B]


def pack_params(params):
    """One-time host-side repack into the fused-kernel layout.

    * gate columns reordered [i, f, g, o] -> [i, f, o, g]
    * fwd/bwd input-projection weights concatenated to (D, 8H)
    * matmul weights cast to bf16 (biases stay f32)
    """
    def reorder(w):  # last axis: [i,f,g,o] -> [i,f,o,g]
        H = w.shape[-1] // 4
        return jnp.concatenate([w[..., 0:2 * H], w[..., 3 * H:4 * H],
                                w[..., 2 * H:3 * H]], axis=-1)

    layers = []
    for layer in params["lstm"]:
        wih_f, whh_f, b_f = layer["fwd"]
        wih_b, whh_b, b_b = layer["bwd"]
        wih = jnp.concatenate([reorder(wih_f), reorder(wih_b)],
                              axis=1).astype(jnp.bfloat16)          # (D, 8H)
        b = jnp.concatenate([reorder(b_f), reorder(b_b)], axis=1)   # (1, 8H) f32
        layers.append((wih,
                       reorder(whh_f).astype(jnp.bfloat16),         # (H, 4H)
                       reorder(whh_b).astype(jnp.bfloat16),
                       b))
    return {"layers": layers,
            "w_lin": params["w_lin"].astype(jnp.bfloat16),
            "b_lin": params["b_lin"]}


# ----------------------------------------------------------------------------
# Deterministic parameter init (same shapes as the PyTorch module)
# ----------------------------------------------------------------------------
def init_params(key, input_size, hidden_dim, output_size, num_layers=2):
    k = 1.0 / jnp.sqrt(jnp.float32(hidden_dim))
    keys = iter(jax.random.split(key, 64))

    def u(shape):
        return jax.random.uniform(next(keys), shape, jnp.float32, -k, k)

    lstm_layers = []
    for layer in range(num_layers):
        D = input_size if layer == 0 else 2 * hidden_dim
        layer_p = {}
        for direction in ("fwd", "bwd"):
            wih = u((D, 4 * hidden_dim))                  # (D, 4H)  == W_ih^T
            whh = u((hidden_dim, 4 * hidden_dim))         # (H, 4H)  == W_hh^T
            b = (u((4 * hidden_dim,)) + u((4 * hidden_dim,)))[None, :]  # b_ih+b_hh
            layer_p[direction] = (wih, whh, b)
        lstm_layers.append(layer_p)

    kl = 1.0 / jnp.sqrt(jnp.float32(2 * hidden_dim))
    w_lin = jax.random.uniform(next(keys), (2 * hidden_dim, output_size),
                               jnp.float32, -kl, kl)
    b_lin = jax.random.uniform(next(keys), (1, output_size),
                               jnp.float32, -kl, kl)
    return {"lstm": lstm_layers, "w_lin": w_lin, "b_lin": b_lin}


# ----------------------------------------------------------------------------
# Pure-JAX f32 reference (gate order [i, f, g, o], unpacked params)
# ----------------------------------------------------------------------------
def _lstm_ref_dir(x_tbd, wih, whh, b):
    H = whh.shape[0]
    B = x_tbd.shape[1]

    def step(carry, x_t):
        h, c = carry
        gates = x_t @ wih + h @ whh + b
        i = jax.nn.sigmoid(gates[:, 0 * H:1 * H])
        f = jax.nn.sigmoid(gates[:, 1 * H:2 * H])
        g = jnp.tanh(gates[:, 2 * H:3 * H])
        o = jax.nn.sigmoid(gates[:, 3 * H:4 * H])
        c = f * c + i * g
        h = o * jnp.tanh(c)
        return (h, c), h

    init = (jnp.zeros((B, H), jnp.float32), jnp.zeros((B, H), jnp.float32))
    _, hs = lax.scan(step, init, x_tbd)
    return hs


def blstm_ref(params, x):
    x_tbd = jnp.transpose(x, (1, 0, 2))
    layer_in = x_tbd
    for layer in params["lstm"]:
        fwd = _lstm_ref_dir(layer_in, *layer["fwd"])
        bwd = _lstm_ref_dir(layer_in[::-1], *layer["bwd"])[::-1]
        layer_in = jnp.concatenate([fwd, bwd], axis=-1)
    out_last = layer_in[-1]
    return out_last @ params["w_lin"] + params["b_lin"]


# ----------------------------------------------------------------------------
if __name__ == "__main__":
    B, T, INPUT, HIDDEN, OUTPUT = 2, 8, 15, 32, 15

    key = jax.random.PRNGKey(0)
    kx, kp = jax.random.split(key)
    x = jax.random.normal(kx, (B, T, INPUT), jnp.float32)
    params = init_params(kp, INPUT, HIDDEN, OUTPUT)
    packed = pack_params(params)

    y = blstm_forward(packed, x)
    y = jax.block_until_ready(y)
    assert y.shape == (B, OUTPUT)

    # Kernel uses bf16 MXU operands -> compare to the f32 reference with a
    # tolerance that covers bf16 quantization (measured error ~1e-3).
    y_ref = blstm_ref(params, x)
    assert jnp.allclose(y, y_ref, rtol=2e-2, atol=2e-2)

    print("KERNEL_OK")
</pallas_src>

<mosaic_0001>
module attributes {stable_mosaic.version = 11 : i64} {
  func.func @_blstm_kernel(%arg0: memref<64x15xbf16, #tpu.memory_space<vmem>>, %arg1: memref<15x256xbf16, #tpu.memory_space<vmem>>, %arg2: memref<32x128xbf16, #tpu.memory_space<vmem>>, %arg3: memref<32x128xbf16, #tpu.memory_space<vmem>>, %arg4: memref<1x256xf32, #tpu.memory_space<vmem>>, %arg5: memref<64x256xbf16, #tpu.memory_space<vmem>>, %arg6: memref<32x128xbf16, #tpu.memory_space<vmem>>, %arg7: memref<32x128xbf16, #tpu.memory_space<vmem>>, %arg8: memref<1x256xf32, #tpu.memory_space<vmem>>, %arg9: memref<64x15xbf16, #tpu.memory_space<vmem>>, %arg10: memref<1x15xf32, #tpu.memory_space<vmem>>, %arg11: memref<8x15xf32, #tpu.memory_space<vmem>>, %arg12: memref<64x256xf32, #tpu.memory_space<vmem>>, %arg13: memref<64x64xf32, #tpu.memory_space<vmem>>) attributes {dimension_semantics = [], scalar_prefetch = 0 : i64, scratch_operands = 2 : i64, tpu.core_type = #tpu.core_type<tc>} {
    %c0 = arith.constant 0 : index
    %c0_0 = arith.constant 0 : index
    %0 = vector.load %arg0[%c0, %c0_0] : memref<64x15xbf16, #tpu.memory_space<vmem>>, vector<64x15xbf16>
    %c0_1 = arith.constant 0 : index
    %c0_2 = arith.constant 0 : index
    %1 = vector.load %arg1[%c0_1, %c0_2] : memref<15x256xbf16, #tpu.memory_space<vmem>>, vector<15x256xbf16>
    %cst = arith.constant dense<0.000000e+00> : vector<64x256xf32>
    %2 = tpu.matmul %0, %1, %cst {dimension_numbers = #tpu.dot_dimension_numbers<[1], [0], [0], [1], [0, 0, 1, 1], [], []>} : vector<64x15xbf16>, vector<15x256xbf16>, vector<64x256xf32> -> vector<64x256xf32>
    %c0_3 = arith.constant 0 : index
    %c0_4 = arith.constant 0 : index
    %3 = vector.load %arg4[%c0_3, %c0_4] : memref<1x256xf32, #tpu.memory_space<vmem>>, vector<1x256xf32>
    %4 = vector.broadcast %3 : vector<1x256xf32> to vector<64x256xf32>
    %5 = arith.addf %2, %4 : vector<64x256xf32>
    %c0_5 = arith.constant 0 : index
    %c0_6 = arith.constant 0 : index
    %6 = vector.load %arg12[%c0_5, %c0_6] : memref<64x256xf32, #tpu.memory_space<vmem>>, vector<64x256xf32>
    tpu.vector_store %arg12[%c0_5, %c0_6], %5 {strides = array<i32>} : memref<64x256xf32, #tpu.memory_space<vmem>>, vector<64x256xf32>,
    %c0_7 = arith.constant 0 : index
    %c0_8 = arith.constant 0 : index
    %7 = vector.load %arg2[%c0_7, %c0_8] : memref<32x128xbf16, #tpu.memory_space<vmem>>, vector<32x128xbf16>
    %c0_9 = arith.constant 0 : index
    %c0_10 = arith.constant 0 : index
    %8 = vector.load %arg3[%c0_9, %c0_10] : memref<32x128xbf16, #tpu.memory_space<vmem>>, vector<32x128xbf16>
    %cst_11 = arith.constant 0.000000e+00 : f32
    %9 = vector.broadcast %cst_11 : f32 to vector<8x32xf32>
    %c0_12 = arith.constant 0 : index
    %c0_13 = arith.constant 0 : index
    %10 = vector.load %arg12[%c0_12, %c0_13] : memref<64x256xf32, #tpu.memory_space<vmem>>, vector<8x128xf32>
    %c56 = arith.constant 56 : index
    %c128 = arith.constant 128 : index
    %11 = vector.load %arg12[%c56, %c128] : memref<64x256xf32, #tpu.memory_space<vmem>>, vector<8x128xf32>
    %12 = vector.extract_strided_slice %10 {offsets = [0, 0], sizes = [8, 96], strides = [1, 1]} : vector<8x128xf32> to vector<8x96xf32>
    %13 = arith.negf %12 : vector<8x96xf32>
    %14 = math.exp %13 : vector<8x96xf32>
    %cst_14 = arith.constant 1.000000e+00 : f32
    %15 = vector.broadcast %cst_14 : f32 to vector<8x96xf32>
    %16 = arith.addf %15, %14 : vector<8x96xf32>
    %17 = arith.divf %15, %16 : vector<8x96xf32>
    %18 = vector.extract_strided_slice %10 {offsets = [0, 96], sizes = [8, 32], strides = [1, 1]} : vector<8x128xf32> to vector<8x32xf32>
    %19 = math.tanh %18 : vector<8x32xf32>
    %20 = vector.extract_strided_slice %17 {offsets = [0, 0], sizes = [8, 32], strides = [1, 1]} : vector<8x96xf32> to vector<8x32xf32>
    %21 = vector.extract_strided_slice %17 {offsets = [0, 32], sizes = [8, 32], strides = [1, 1]} : vector<8x96xf32> to vector<8x32xf32>
    %22 = vector.extract_strided_slice %17 {offsets = [0, 64], sizes = [8, 32], strides = [1, 1]} : vector<8x96xf32> to vector<8x32xf32>
    %23 = arith.mulf %21, %9 : vector<8x32xf32>
    %24 = arith.mulf %20, %19 : vector<8x32xf32>
    %25 = arith.addf %23, %24 : vector<8x32xf32>
    %26 = math.tanh %25 : vector<8x32xf32>
    %27 = arith.mulf %22, %26 : vector<8x32xf32>
    %28 = vector.extract_strided_slice %11 {offsets = [0, 0], sizes = [8, 96], strides = [1, 1]} : vector<8x128xf32> to vector<8x96xf32>
    %29 = arith.negf %28 : vector<8x96xf32>
    %30 = math.exp %29 : vector<8x96xf32>
    %cst_15 = arith.constant 1.000000e+00 : f32
    %31 = vector.broadcast %cst_15 : f32 to vector<8x96xf32>
    %32 = arith.addf %31, %30 : vector<8x96xf32>
    %33 = arith.divf %31, %32 : vector<8x96xf32>
    %34 = vector.extract_strided_slice %11 {offsets = [0, 96], sizes = [8, 32], strides = [1, 1]} : vector<8x128xf32> to vector<8x32xf32>
    %35 = math.tanh %34 : vector<8x32xf32>
    %36 = vector.extract_strided_slice %33 {offsets = [0, 0], sizes = [8, 32], strides = [1, 1]} : vector<8x96xf32> to vector<8x32xf32>
    %37 = vector.extract_strided_slice %33 {offsets = [0, 32], sizes = [8, 32], strides = [1, 1]} : vector<8x96xf32> to vector<8x32xf32>
    %38 = vector.extract_strided_slice %33 {offsets = [0, 64], sizes = [8, 32], strides = [1, 1]} : vector<8x96xf32> to vector<8x32xf32>
    %39 = arith.mulf %37, %9 : vector<8x32xf32>
    %40 = arith.mulf %36, %35 : vector<8x32xf32>
    %41 = arith.addf %39, %40 : vector<8x32xf32>
    %42 = math.tanh %41 : vector<8x32xf32>
    %43 = arith.mulf %38, %42 : vector<8x32xf32>
    %c0_16 = arith.constant 0 : index
    %c0_17 = arith.constant 0 : index
    %44 = vector.load %arg13[%c0_16, %c0_17] : memref<64x64xf32, #tpu.memory_space<vmem>>, vector<8x32xf32>
    tpu.vector_store %arg13[%c0_16, %c0_17], %27 {strides = array<i32>} : memref<64x64xf32, #tpu.memory_space<vmem>>, vector<8x32xf32>,
    %c56_18 = arith.constant 56 : index
    %c32 = arith.constant 32 : index
    %45 = vector.load %arg13[%c56_18, %c32] : memref<64x64xf32, #tpu.memory_space<vmem>>, vector<8x32xf32>
    tpu.vector_store %arg13[%c56_18, %c32], %43 {strides = array<i32>} : memref<64x64xf32, #tpu.memory_space<vmem>>, vector<8x32xf32>,
    %c8 = arith.constant 8 : index
    %c0_19 = arith.constant 0 : index
    %46 = vector.load %arg12[%c8, %c0_19] : memref<64x256xf32, #tpu.memory_space<vmem>>, vector<8x128xf32>
    %c48 = arith.constant 48 : index
    %c128_20 = arith.constant 128 : index
    %47 = vector.load %arg12[%c48, %c128_20] : memref<64x256xf32, #tpu.memory_space<vmem>>, vector<8x128xf32>
    %48 = arith.truncf %27 : vector<8x32xf32> to vector<8x32xbf16>
    %cst_21 = arith.constant dense<0.000000e+00> : vector<8x128xf32>
    %49 = tpu.matmul %48, %7, %cst_21 {dimension_numbers = #tpu.dot_dimension_numbers<[1], [0], [0], [1], [0, 0, 1, 1], [], []>} : vector<8x32xbf16>, vector<32x128xbf16>, vector<8x128xf32> -> vector<8x128xf32>
    %50 = arith.addf %46, %49 : vector<8x128xf32>
    %51 = arith.truncf %43 : vector<8x32xf32> to vector<8x32xbf16>
    %cst_22 = arith.constant dense<0.000000e+00> : vector<8x128xf32>
    %52 = tpu.matmul %51, %8, %cst_22 {dimension_numbers = #tpu.dot_dimension_numbers<[1], [0], [0], [1], [0, 0, 1, 1], [], []>} : vector<8x32xbf16>, vector<32x128xbf16>, vector<8x128xf32> -> vector<8x128xf32>
    %53 = arith.addf %47, %52 : vector<8x128xf32>
    %54 = vector.extract_strided_slice %50 {offsets = [0, 0], sizes = [8, 96], strides = [1, 1]} : vector<8x128xf32> to vector<8x96xf32>
    %55 = arith.negf %54 : vector<8x96xf32>
    %56 = math.exp %55 : vector<8x96xf32>
    %cst_23 = arith.constant 1.000000e+00 : f32
    %57 = vector.broadcast %cst_23 : f32 to vector<8x96xf32>
    %58 = arith.addf %57, %56 : vector<8x96xf32>
    %59 = arith.divf %57, %58 : vector<8x96xf32>
    %60 = vector.extract_strided_slice %50 {offsets = [0, 96], sizes = [8, 32], strides = [1, 1]} : vector<8x128xf32> to vector<8x32xf32>
    %61 = math.tanh %60 : vector<8x32xf32>
    %62 = vector.extract_strided_slice %59 {offsets = [0, 0], sizes = [8, 32], strides = [1, 1]} : vector<8x96xf32> to vector<8x32xf32>
    %63 = vector.extract_strided_slice %59 {offsets = [0, 32], sizes = [8, 32], strides = [1, 1]} : vector<8x96xf32> to vector<8x32xf32>
    %64 = vector.extract_strided_slice %59 {offsets = [0, 64], sizes = [8, 32], strides = [1, 1]} : vector<8x96xf32> to vector<8x32xf32>
    %65 = arith.mulf %63, %25 : vector<8x32xf32>
    %66 = arith.mulf %62, %61 : vector<8x32xf32>
    %67 = arith.addf %65, %66 : vector<8x32xf32>
    %68 = math.tanh %67 : vector<8x32xf32>
    %69 = arith.mulf %64, %68 : vector<8x32xf32>
    %70 = vector.extract_strided_slice %53 {offsets = [0, 0], sizes = [8, 96], strides = [1, 1]} : vector<8x128xf32> to vector<8x96xf32>
    %71 = arith.negf %70 : vector<8x96xf32>
    %72 = math.exp %71 : vector<8x96xf32>
    %cst_24 = arith.constant 1.000000e+00 : f32
    %73 = vector.broadcast %cst_24 : f32 to vector<8x96xf32>
    %74 = arith.addf %73, %72 : vector<8x96xf32>
    %75 = arith.divf %73, %74 : vector<8x96xf32>
    %76 = vector.extract_strided_slice %53 {offsets = [0, 96], sizes = [8, 32], strides = [1, 1]} : vector<8x128xf32> to vector<8x32xf32>
    %77 = math.tanh %76 : vector<8x32xf32>
    %78 = vector.extract_strided_slice %75 {offsets = [0, 0], sizes = [8, 32], strides = [1, 1]} : vector<8x96xf32> to vector<8x32xf32>
    %79 = vector.extract_strided_slice %75 {offsets = [0, 32], sizes = [8, 32], strides = [1, 1]} : vector<8x96xf32> to vector<8x32xf32>
    %80 = vector.extract_strided_slice %75 {offsets = [0, 64], sizes = [8, 32], strides = [1, 1]} : vector<8x96xf32> to vector<8x32xf32>
    %81 = arith.mulf %79, %41 : vector<8x32xf32>
    %82 = arith.mulf %78, %77 : vector<8x32xf32>
    %83 = arith.addf %81, %82 : vector<8x32xf32>
    %84 = math.tanh %83 : vector<8x32xf32>
    %85 = arith.mulf %80, %84 : vector<8x32xf32>
    %c8_25 = arith.constant 8 : index
    %c0_26 = arith.constant 0 : index
    %86 = vector.load %arg13[%c8_25, %c0_26] : memref<64x64xf32, #tpu.memory_space<vmem>>, vector<8x32xf32>
    tpu.vector_store %arg13[%c8_25, %c0_26], %69 {strides = array<i32>} : memref<64x64xf32, #tpu.memory_space<vmem>>, vector<8x32xf32>,
    %c48_27 = arith.constant 48 : index
    %c32_28 = arith.constant 32 : index
    %87 = vector.load %arg13[%c48_27, %c32_28] : memref<64x64xf32, #tpu.memory_space<vmem>>, vector<8x32xf32>
    tpu.vector_store %arg13[%c48_27, %c32_28], %85 {strides = array<i32>} : memref<64x64xf32, #tpu.memory_space<vmem>>, vector<8x32xf32>,
    %c16 = arith.constant 16 : index
    %c0_29 = arith.constant 0 : index
    %88 = vector.load %arg12[%c16, %c0_29] : memref<64x256xf32, #tpu.memory_space<vmem>>, vector<8x128xf32>
    %c40 = arith.constant 40 : index
    %c128_30 = arith.constant 128 : index
    %89 = vector.load %arg12[%c40, %c128_30] : memref<64x256xf32, #tpu.memory_space<vmem>>, vector<8x128xf32>
    %90 = arith.truncf %69 : vector<8x32xf32> to vector<8x32xbf16>
    %cst_31 = arith.constant dense<0.000000e+00> : vector<8x128xf32>
    %91 = tpu.matmul %90, %7, %cst_31 {dimension_numbers = #tpu.dot_dimension_numbers<[1], [0], [0], [1], [0, 0, 1, 1], [], []>} : vector<8x32xbf16>, vector<32x128xbf16>, vector<8x128xf32> -> vector<8x128xf32>
    %92 = arith.addf %88, %91 : vector<8x128xf32>
    %93 = arith.truncf %85 : vector<8x32xf32> to vector<8x32xbf16>
    %cst_32 = arith.constant dense<0.000000e+00> : vector<8x128xf32>
    %94 = tpu.matmul %93, %8, %cst_32 {dimension_numbers = #tpu.dot_dimension_numbers<[1], [0], [0], [1], [0, 0, 1, 1], [], []>} : vector<8x32xbf16>, vector<32x128xbf16>, vector<8x128xf32> -> vector<8x128xf32>
    %95 = arith.addf %89, %94 : vector<8x128xf32>
    %96 = vector.extract_strided_slice %92 {offsets = [0, 0], sizes = [8, 96], strides = [1, 1]} : vector<8x128xf32> to vector<8x96xf32>
    %97 = arith.negf %96 : vector<8x96xf32>
    %98 = math.exp %97 : vector<8x96xf32>
    %cst_33 = arith.constant 1.000000e+00 : f32
    %99 = vector.broadcast %cst_33 : f32 to vector<8x96xf32>
    %100 = arith.addf %99, %98 : vector<8x96xf32>
    %101 = arith.divf %99, %100 : vector<8x96xf32>
    %102 = vector.extract_strided_slice %92 {offsets = [0, 96], sizes = [8, 32], strides = [1, 1]} : vector<8x128xf32> to vector<8x32xf32>
    %103 = math.tanh %102 : vector<8x32xf32>
    %104 = vector.extract_strided_slice %101 {offsets = [0, 0], sizes = [8, 32], strides = [1, 1]} : vector<8x96xf32> to vector<8x32xf32>
    %105 = vector.extract_strided_slice %101 {offsets = [0, 32], sizes = [8, 32], strides = [1, 1]} : vector<8x96xf32> to vector<8x32xf32>
    %106 = vector.extract_strided_slice %101 {offsets = [0, 64], sizes = [8, 32], strides = [1, 1]} : vector<8x96xf32> to vector<8x32xf32>
    %107 = arith.mulf %105, %67 : vector<8x32xf32>
    %108 = arith.mulf %104, %103 : vector<8x32xf32>
    %109 = arith.addf %107, %108 : vector<8x32xf32>
    %110 = math.tanh %109 : vector<8x32xf32>
    %111 = arith.mulf %106, %110 : vector<8x32xf32>
    %112 = vector.extract_strided_slice %95 {offsets = [0, 0], sizes = [8, 96], strides = [1, 1]} : vector<8x128xf32> to vector<8x96xf32>
    %113 = arith.negf %112 : vector<8x96xf32>
    %114 = math.exp %113 : vector<8x96xf32>
    %cst_34 = arith.constant 1.000000e+00 : f32
    %115 = vector.broadcast %cst_34 : f32 to vector<8x96xf32>
    %116 = arith.addf %115, %114 : vector<8x96xf32>
    %117 = arith.divf %115, %116 : vector<8x96xf32>
    %118 = vector.extract_strided_slice %95 {offsets = [0, 96], sizes = [8, 32], strides = [1, 1]} : vector<8x128xf32> to vector<8x32xf32>
    %119 = math.tanh %118 : vector<8x32xf32>
    %120 = vector.extract_strided_slice %117 {offsets = [0, 0], sizes = [8, 32], strides = [1, 1]} : vector<8x96xf32> to vector<8x32xf32>
    %121 = vector.extract_strided_slice %117 {offsets = [0, 32], sizes = [8, 32], strides = [1, 1]} : vector<8x96xf32> to vector<8x32xf32>
    %122 = vector.extract_strided_slice %117 {offsets = [0, 64], sizes = [8, 32], strides = [1, 1]} : vector<8x96xf32> to vector<8x32xf32>
    %123 = arith.mulf %121, %83 : vector<8x32xf32>
    %124 = arith.mulf %120, %119 : vector<8x32xf32>
    %125 = arith.addf %123, %124 : vector<8x32xf32>
    %126 = math.tanh %125 : vector<8x32xf32>
    %127 = arith.mulf %122, %126 : vector<8x32xf32>
    %c16_35 = arith.constant 16 : index
    %c0_36 = arith.constant 0 : index
    %128 = vector.load %arg13[%c16_35, %c0_36] : memref<64x64xf32, #tpu.memory_space<vmem>>, vector<8x32xf32>
    tpu.vector_store %arg13[%c16_35, %c0_36], %111 {strides = array<i32>} : memref<64x64xf32, #tpu.memory_space<vmem>>, vector<8x32xf32>,
    %c40_37 = arith.constant 40 : index
    %c32_38 = arith.constant 32 : index
    %129 = vector.load %arg13[%c40_37, %c32_38] : memref<64x64xf32, #tpu.memory_space<vmem>>, vector<8x32xf32>
    tpu.vector_store %arg13[%c40_37, %c32_38], %127 {strides = array<i32>} : memref<64x64xf32, #tpu.memory_space<vmem>>, vector<8x32xf32>,
    %c24 = arith.constant 24 : index
    %c0_39 = arith.constant 0 : index
    %130 = vector.load %arg12[%c24, %c0_39] : memref<64x256xf32, #tpu.memory_space<vmem>>, vector<8x128xf32>
    %c32_40 = arith.constant 32 : index
    %c128_41 = arith.constant 128 : index
    %131 = vector.load %arg12[%c32_40, %c128_41] : memref<64x256xf32, #tpu.memory_space<vmem>>, vector<8x128xf32>
    %132 = arith.truncf %111 : vector<8x32xf32> to vector<8x32xbf16>
    %cst_42 = arith.constant dense<0.000000e+00> : vector<8x128xf32>
    %133 = tpu.matmul %132, %7, %cst_42 {dimension_numbers = #tpu.dot_dimension_numbers<[1], [0], [0], [1], [0, 0, 1, 1], [], []>} : vector<8x32xbf16>, vector<32x128xbf16>, vector<8x128xf32> -> vector<8x128xf32>
    %134 = arith.addf %130, %133 : vector<8x128xf32>
    %135 = arith.truncf %127 : vector<8x32xf32> to vector<8x32xbf16>
    %cst_43 = arith.constant dense<0.000000e+00> : vector<8x128xf32>
    %136 = tpu.matmul %135, %8, %cst_43 {dimension_numbers = #tpu.dot_dimension_numbers<[1], [0], [0], [1], [0, 0, 1, 1], [], []>} : vector<8x32xbf16>, vector<32x128xbf16>, vector<8x128xf32> -> vector<8x128xf32>
    %137 = arith.addf %131, %136 : vector<8x128xf32>
    %138 = vector.extract_strided_slice %134 {offsets = [0, 0], sizes = [8, 96], strides = [1, 1]} : vector<8x128xf32> to vector<8x96xf32>
    %139 = arith.negf %138 : vector<8x96xf32>
    %140 = math.exp %139 : vector<8x96xf32>
    %cst_44 = arith.constant 1.000000e+00 : f32
    %141 = vector.broadcast %cst_44 : f32 to vector<8x96xf32>
    %142 = arith.addf %141, %140 : vector<8x96xf32>
    %143 = arith.divf %141, %142 : vector<8x96xf32>
    %144 = vector.extract_strided_slice %134 {offsets = [0, 96], sizes = [8, 32], strides = [1, 1]} : vector<8x128xf32> to vector<8x32xf32>
    %145 = math.tanh %144 : vector<8x32xf32>
    %146 = vector.extract_strided_slice %143 {offsets = [0, 0], sizes = [8, 32], strides = [1, 1]} : vector<8x96xf32> to vector<8x32xf32>
    %147 = vector.extract_strided_slice %143 {offsets = [0, 32], sizes = [8, 32], strides = [1, 1]} : vector<8x96xf32> to vector<8x32xf32>
    %148 = vector.extract_strided_slice %143 {offsets = [0, 64], sizes = [8, 32], strides = [1, 1]} : vector<8x96xf32> to vector<8x32xf32>
    %149 = arith.mulf %147, %109 : vector<8x32xf32>
    %150 = arith.mulf %146, %145 : vector<8x32xf32>
    %151 = arith.addf %149, %150 : vector<8x32xf32>
    %152 = math.tanh %151 : vector<8x32xf32>
    %153 = arith.mulf %148, %152 : vector<8x32xf32>
    %154 = vector.extract_strided_slice %137 {offsets = [0, 0], sizes = [8, 96], strides = [1, 1]} : vector<8x128xf32> to vector<8x96xf32>
    %155 = arith.negf %154 : vector<8x96xf32>
    %156 = math.exp %155 : vector<8x96xf32>
    %cst_45 = arith.constant 1.000000e+00 : f32
    %157 = vector.broadcast %cst_45 : f32 to vector<8x96xf32>
    %158 = arith.addf %157, %156 : vector<8x96xf32>
    %159 = arith.divf %157, %158 : vector<8x96xf32>
    %160 = vector.extract_strided_slice %137 {offsets = [0, 96], sizes = [8, 32], strides = [1, 1]} : vector<8x128xf32> to vector<8x32xf32>
    %161 = math.tanh %160 : vector<8x32xf32>
    %162 = vector.extract_strided_slice %159 {offsets = [0, 0], sizes = [8, 32], strides = [1, 1]} : vector<8x96xf32> to vector<8x32xf32>
    %163 = vector.extract_strided_slice %159 {offsets = [0, 32], sizes = [8, 32], strides = [1, 1]} : vector<8x96xf32> to vector<8x32xf32>
    %164 = vector.extract_strided_slice %159 {offsets = [0, 64], sizes = [8, 32], strides = [1, 1]} : vector<8x96xf32> to vector<8x32xf32>
    %165 = arith.mulf %163, %125 : vector<8x32xf32>
    %166 = arith.mulf %162, %161 : vector<8x32xf32>
    %167 = arith.addf %165, %166 : vector<8x32xf32>
    %168 = math.tanh %167 : vector<8x32xf32>
    %169 = arith.mulf %164, %168 : vector<8x32xf32>
    %c24_46 = arith.constant 24 : index
    %c0_47 = arith.constant 0 : index
    %170 = vector.load %arg13[%c24_46, %c0_47] : memref<64x64xf32, #tpu.memory_space<vmem>>, vector<8x32xf32>
    tpu.vector_store %arg13[%c24_46, %c0_47], %153 {strides = array<i32>} : memref<64x64xf32, #tpu.memory_space<vmem>>, vector<8x32xf32>,
    %c32_48 = arith.constant 32 : index
    %c32_49 = arith.constant 32 : index
    %171 = vector.load %arg13[%c32_48, %c32_49] : memref<64x64xf32, #tpu.memory_space<vmem>>, vector<8x32xf32>
    tpu.vector_store %arg13[%c32_48, %c32_49], %169 {strides = array<i32>} : memref<64x64xf32, #tpu.memory_space<vmem>>, vector<8x32xf32>,
    %c32_50 = arith.constant 32 : index
    %c0_51 = arith.constant 0 : index
    %172 = vector.load %arg12[%c32_50, %c0_51] : memref<64x256xf32, #tpu.memory_space<vmem>>, vector<8x128xf32>
    %c24_52 = arith.constant 24 : index
    %c128_53 = arith.constant 128 : index
    %173 = vector.load %arg12[%c24_52, %c128_53] : memref<64x256xf32, #tpu.memory_space<vmem>>, vector<8x128xf32>
    %174 = arith.truncf %153 : vector<8x32xf32> to vector<8x32xbf16>
    %cst_54 = arith.constant dense<0.000000e+00> : vector<8x128xf32>
    %175 = tpu.matmul %174, %7, %cst_54 {dimension_numbers = #tpu.dot_dimension_numbers<[1], [0], [0], [1], [0, 0, 1, 1], [], []>} : vector<8x32xbf16>, vector<32x128xbf16>, vector<8x128xf32> -> vector<8x128xf32>
    %176 = arith.addf %172, %175 : vector<8x128xf32>
    %177 = arith.truncf %169 : vector<8x32xf32> to vector<8x32xbf16>
    %cst_55 = arith.constant dense<0.000000e+00> : vector<8x128xf32>
    %178 = tpu.matmul %177, %8, %cst_55 {dimension_numbers = #tpu.dot_dimension_numbers<[1], [0], [0], [1], [0, 0, 1, 1], [], []>} : vector<8x32xbf16>, vector<32x128xbf16>, vector<8x128xf32> -> vector<8x128xf32>
    %179 = arith.addf %173, %178 : vector<8x128xf32>
    %180 = vector.extract_strided_slice %176 {offsets = [0, 0], sizes = [8, 96], strides = [1, 1]} : vector<8x128xf32> to vector<8x96xf32>
    %181 = arith.negf %180 : vector<8x96xf32>
    %182 = math.exp %181 : vector<8x96xf32>
    %cst_56 = arith.constant 1.000000e+00 : f32
    %183 = vector.broadcast %cst_56 : f32 to vector<8x96xf32>
    %184 = arith.addf %183, %182 : vector<8x96xf32>
    %185 = arith.divf %183, %184 : vector<8x96xf32>
    %186 = vector.extract_strided_slice %176 {offsets = [0, 96], sizes = [8, 32], strides = [1, 1]} : vector<8x128xf32> to vector<8x32xf32>
    %187 = math.tanh %186 : vector<8x32xf32>
    %188 = vector.extract_strided_slice %185 {offsets = [0, 0], sizes = [8, 32], strides = [1, 1]} : vector<8x96xf32> to vector<8x32xf32>
    %189 = vector.extract_strided_slice %185 {offsets = [0, 32], sizes = [8, 32], strides = [1, 1]} : vector<8x96xf32> to vector<8x32xf32>
    %190 = vector.extract_strided_slice %185 {offsets = [0, 64], sizes = [8, 32], strides = [1, 1]} : vector<8x96xf32> to vector<8x32xf32>
    %191 = arith.mulf %189, %151 : vector<8x32xf32>
    %192 = arith.mulf %188, %187 : vector<8x32xf32>
    %193 = arith.addf %191, %192 : vector<8x32xf32>
    %194 = math.tanh %193 : vector<8x32xf32>
    %195 = arith.mulf %190, %194 : vector<8x32xf32>
    %196 = vector.extract_strided_slice %179 {offsets = [0, 0], sizes = [8, 96], strides = [1, 1]} : vector<8x128xf32> to vector<8x96xf32>
    %197 = arith.negf %196 : vector<8x96xf32>
    %198 = math.exp %197 : vector<8x96xf32>
    %cst_57 = arith.constant 1.000000e+00 : f32
    %199 = vector.broadcast %cst_57 : f32 to vector<8x96xf32>
    %200 = arith.addf %199, %198 : vector<8x96xf32>
    %201 = arith.divf %199, %200 : vector<8x96xf32>
    %202 = vector.extract_strided_slice %179 {offsets = [0, 96], sizes = [8, 32], strides = [1, 1]} : vector<8x128xf32> to vector<8x32xf32>
    %203 = math.tanh %202 : vector<8x32xf32>
    %204 = vector.extract_strided_slice %201 {offsets = [0, 0], sizes = [8, 32], strides = [1, 1]} : vector<8x96xf32> to vector<8x32xf32>
    %205 = vector.extract_strided_slice %201 {offsets = [0, 32], sizes = [8, 32], strides = [1, 1]} : vector<8x96xf32> to vector<8x32xf32>
    %206 = vector.extract_strided_slice %201 {offsets = [0, 64], sizes = [8, 32], strides = [1, 1]} : vector<8x96xf32> to vector<8x32xf32>
    %207 = arith.mulf %205, %167 : vector<8x32xf32>
    %208 = arith.mulf %204, %203 : vector<8x32xf32>
    %209 = arith.addf %207, %208 : vector<8x32xf32>
    %210 = math.tanh %209 : vector<8x32xf32>
    %211 = arith.mulf %206, %210 : vector<8x32xf32>
    %c32_58 = arith.constant 32 : index
    %c0_59 = arith.constant 0 : index
    %212 = vector.load %arg13[%c32_58, %c0_59] : memref<64x64xf32, #tpu.memory_space<vmem>>, vector<8x32xf32>
    tpu.vector_store %arg13[%c32_58, %c0_59], %195 {strides = array<i32>} : memref<64x64xf32, #tpu.memory_space<vmem>>, vector<8x32xf32>,
    %c24_60 = arith.constant 24 : index
    %c32_61 = arith.constant 32 : index
    %213 = vector.load %arg13[%c24_60, %c32_61] : memref<64x64xf32, #tpu.memory_space<vmem>>, vector<8x32xf32>
    tpu.vector_store %arg13[%c24_60, %c32_61], %211 {strides = array<i32>} : memref<64x64xf32, #tpu.memory_space<vmem>>, vector<8x32xf32>,
    %c40_62 = arith.constant 40 : index
    %c0_63 = arith.constant 0 : index
    %214 = vector.load %arg12[%c40_62, %c0_63] : memref<64x256xf32, #tpu.memory_space<vmem>>, vector<8x128xf32>
    %c16_64 = arith.constant 16 : index
    %c128_65 = arith.constant 128 : index
    %215 = vector.load %arg12[%c16_64, %c128_65] : memref<64x256xf32, #tpu.memory_space<vmem>>, vector<8x128xf32>
    %216 = arith.truncf %195 : vector<8x32xf32> to vector<8x32xbf16>
    %cst_66 = arith.constant dense<0.000000e+00> : vector<8x128xf32>
    %217 = tpu.matmul %216, %7, %cst_66 {dimension_numbers = #tpu.dot_dimension_numbers<[1], [0], [0], [1], [0, 0, 1, 1], [], []>} : vector<8x32xbf16>, vector<32x128xbf16>, vector<8x128xf32> -> vector<8x128xf32>
    %218 = arith.addf %214, %217 : vector<8x128xf32>
    %219 = arith.truncf %211 : vector<8x32xf32> to vector<8x32xbf16>
    %cst_67 = arith.constant dense<0.000000e+00> : vector<8x128xf32>
    %220 = tpu.matmul %219, %8, %cst_67 {dimension_numbers = #tpu.dot_dimension_numbers<[1], [0], [0], [1], [0, 0, 1, 1], [], []>} : vector<8x32xbf16>, vector<32x128xbf16>, vector<8x128xf32> -> vector<8x128xf32>
    %221 = arith.addf %215, %220 : vector<8x128xf32>
    %222 = vector.extract_strided_slice %218 {offsets = [0, 0], sizes = [8, 96], strides = [1, 1]} : vector<8x128xf32> to vector<8x96xf32>
    %223 = arith.negf %222 : vector<8x96xf32>
    %224 = math.exp %223 : vector<8x96xf32>
    %cst_68 = arith.constant 1.000000e+00 : f32
    %225 = vector.broadcast %cst_68 : f32 to vector<8x96xf32>
    %226 = arith.addf %225, %224 : vector<8x96xf32>
    %227 = arith.divf %225, %226 : vector<8x96xf32>
    %228 = vector.extract_strided_slice %218 {offsets = [0, 96], sizes = [8, 32], strides = [1, 1]} : vector<8x128xf32> to vector<8x32xf32>
    %229 = math.tanh %228 : vector<8x32xf32>
    %230 = vector.extract_strided_slice %227 {offsets = [0, 0], sizes = [8, 32], strides = [1, 1]} : vector<8x96xf32> to vector<8x32xf32>
    %231 = vector.extract_strided_slice %227 {offsets = [0, 32], sizes = [8, 32], strides = [1, 1]} : vector<8x96xf32> to vector<8x32xf32>
    %232 = vector.extract_strided_slice %227 {offsets = [0, 64], sizes = [8, 32], strides = [1, 1]} : vector<8x96xf32> to vector<8x32xf32>
    %233 = arith.mulf %231, %193 : vector<8x32xf32>
    %234 = arith.mulf %230, %229 : vector<8x32xf32>
    %235 = arith.addf %233, %234 : vector<8x32xf32>
    %236 = math.tanh %235 : vector<8x32xf32>
    %237 = arith.mulf %232, %236 : vector<8x32xf32>
    %238 = vector.extract_strided_slice %221 {offsets = [0, 0], sizes = [8, 96], strides = [1, 1]} : vector<8x128xf32> to vector<8x96xf32>
    %239 = arith.negf %238 : vector<8x96xf32>
    %240 = math.exp %239 : vector<8x96xf32>
    %cst_69 = arith.constant 1.000000e+00 : f32
    %241 = vector.broadcast %cst_69 : f32 to vector<8x96xf32>
    %242 = arith.addf %241, %240 : vector<8x96xf32>
    %243 = arith.divf %241, %242 : vector<8x96xf32>
    %244 = vector.extract_strided_slice %221 {offsets = [0, 96], sizes = [8, 32], strides = [1, 1]} : vector<8x128xf32> to vector<8x32xf32>
    %245 = math.tanh %244 : vector<8x32xf32>
    %246 = vector.extract_strided_slice %243 {offsets = [0, 0], sizes = [8, 32], strides = [1, 1]} : vector<8x96xf32> to vector<8x32xf32>
    %247 = vector.extract_strided_slice %243 {offsets = [0, 32], sizes = [8, 32], strides = [1, 1]} : vector<8x96xf32> to vector<8x32xf32>
    %248 = vector.extract_strided_slice %243 {offsets = [0, 64], sizes = [8, 32], strides = [1, 1]} : vector<8x96xf32> to vector<8x32xf32>
    %249 = arith.mulf %247, %209 : vector<8x32xf32>
    %250 = arith.mulf %246, %245 : vector<8x32xf32>
    %251 = arith.addf %249, %250 : vector<8x32xf32>
    %252 = math.tanh %251 : vector<8x32xf32>
    %253 = arith.mulf %248, %252 : vector<8x32xf32>
    %c40_70 = arith.constant 40 : index
    %c0_71 = arith.constant 0 : index
    %254 = vector.load %arg13[%c40_70, %c0_71] : memref<64x64xf32, #tpu.memory_space<vmem>>, vector<8x32xf32>
    tpu.vector_store %arg13[%c40_70, %c0_71], %237 {strides = array<i32>} : memref<64x64xf32, #tpu.memory_space<vmem>>, vector<8x32xf32>,
    %c16_72 = arith.constant 16 : index
    %c32_73 = arith.constant 32 : index
    %255 = vector.load %arg13[%c16_72, %c32_73] : memref<64x64xf32, #tpu.memory_space<vmem>>, vector<8x32xf32>
    tpu.vector_store %arg13[%c16_72, %c32_73], %253 {strides = array<i32>} : memref<64x64xf32, #tpu.memory_space<vmem>>, vector<8x32xf32>,
    %c48_74 = arith.constant 48 : index
    %c0_75 = arith.constant 0 : index
    %256 = vector.load %arg12[%c48_74, %c0_75] : memref<64x256xf32, #tpu.memory_space<vmem>>, vector<8x128xf32>
    %c8_76 = arith.constant 8 : index
    %c128_77 = arith.constant 128 : index
    %257 = vector.load %arg12[%c8_76, %c128_77] : memref<64x256xf32, #tpu.memory_space<vmem>>, vector<8x128xf32>
    %258 = arith.truncf %237 : vector<8x32xf32> to vector<8x32xbf16>
    %cst_78 = arith.constant dense<0.000000e+00> : vector<8x128xf32>
    %259 = tpu.matmul %258, %7, %cst_78 {dimension_numbers = #tpu.dot_dimension_numbers<[1], [0], [0], [1], [0, 0, 1, 1], [], []>} : vector<8x32xbf16>, vector<32x128xbf16>, vector<8x128xf32> -> vector<8x128xf32>
    %260 = arith.addf %256, %259 : vector<8x128xf32>
    %261 = arith.truncf %253 : vector<8x32xf32> to vector<8x32xbf16>
    %cst_79 = arith.constant dense<0.000000e+00> : vector<8x128xf32>
    %262 = tpu.matmul %261, %8, %cst_79 {dimension_numbers = #tpu.dot_dimension_numbers<[1], [0], [0], [1], [0, 0, 1, 1], [], []>} : vector<8x32xbf16>, vector<32x128xbf16>, vector<8x128xf32> -> vector<8x128xf32>
    %263 = arith.addf %257, %262 : vector<8x128xf32>
    %264 = vector.extract_strided_slice %260 {offsets = [0, 0], sizes = [8, 96], strides = [1, 1]} : vector<8x128xf32> to vector<8x96xf32>
    %265 = arith.negf %264 : vector<8x96xf32>
    %266 = math.exp %265 : vector<8x96xf32>
    %cst_80 = arith.constant 1.000000e+00 : f32
    %267 = vector.broadcast %cst_80 : f32 to vector<8x96xf32>
    %268 = arith.addf %267, %266 : vector<8x96xf32>
    %269 = arith.divf %267, %268 : vector<8x96xf32>
    %270 = vector.extract_strided_slice %260 {offsets = [0, 96], sizes = [8, 32], strides = [1, 1]} : vector<8x128xf32> to vector<8x32xf32>
    %271 = math.tanh %270 : vector<8x32xf32>
    %272 = vector.extract_strided_slice %269 {offsets = [0, 0], sizes = [8, 32], strides = [1, 1]} : vector<8x96xf32> to vector<8x32xf32>
    %273 = vector.extract_strided_slice %269 {offsets = [0, 32], sizes = [8, 32], strides = [1, 1]} : vector<8x96xf32> to vector<8x32xf32>
    %274 = vector.extract_strided_slice %269 {offsets = [0, 64], sizes = [8, 32], strides = [1, 1]} : vector<8x96xf32> to vector<8x32xf32>
    %275 = arith.mulf %273, %235 : vector<8x32xf32>
    %276 = arith.mulf %272, %271 : vector<8x32xf32>
    %277 = arith.addf %275, %276 : vector<8x32xf32>
    %278 = math.tanh %277 : vector<8x32xf32>
    %279 = arith.mulf %274, %278 : vector<8x32xf32>
    %280 = vector.extract_strided_slice %263 {offsets = [0, 0], sizes = [8, 96], strides = [1, 1]} : vector<8x128xf32> to vector<8x96xf32>
    %281 = arith.negf %280 : vector<8x96xf32>
    %282 = math.exp %281 : vector<8x96xf32>
    %cst_81 = arith.constant 1.000000e+00 : f32
    %283 = vector.broadcast %cst_81 : f32 to vector<8x96xf32>
    %284 = arith.addf %283, %282 : vector<8x96xf32>
    %285 = arith.divf %283, %284 : vector<8x96xf32>
    %286 = vector.extract_strided_slice %263 {offsets = [0, 96], sizes = [8, 32], strides = [1, 1]} : vector<8x128xf32> to vector<8x32xf32>
    %287 = math.tanh %286 : vector<8x32xf32>
    %288 = vector.extract_strided_slice %285 {offsets = [0, 0], sizes = [8, 32], strides = [1, 1]} : vector<8x96xf32> to vector<8x32xf32>
    %289 = vector.extract_strided_slice %285 {offsets = [0, 32], sizes = [8, 32], strides = [1, 1]} : vector<8x96xf32> to vector<8x32xf32>
    %290 = vector.extract_strided_slice %285 {offsets = [0, 64], sizes = [8, 32], strides = [1, 1]} : vector<8x96xf32> to vector<8x32xf32>
    %291 = arith.mulf %289, %251 : vector<8x32xf32>
    %292 = arith.mulf %288, %287 : vector<8x32xf32>
    %293 = arith.addf %291, %292 : vector<8x32xf32>
    %294 = math.tanh %293 : vector<8x32xf32>
    %295 = arith.mulf %290, %294 : vector<8x32xf32>
    %c48_82 = arith.constant 48 : index
    %c0_83 = arith.constant 0 : index
    %296 = vector.load %arg13[%c48_82, %c0_83] : memref<64x64xf32, #tpu.memory_space<vmem>>, vector<8x32xf32>
    tpu.vector_store %arg13[%c48_82, %c0_83], %279 {strides = array<i32>} : memref<64x64xf32, #tpu.memory_space<vmem>>, vector<8x32xf32>,
    %c8_84 = arith.constant 8 : index
    %c32_85 = arith.constant 32 : index
    %297 = vector.load %arg13[%c8_84, %c32_85] : memref<64x64xf32, #tpu.memory_space<vmem>>, vector<8x32xf32>
    tpu.vector_store %arg13[%c8_84, %c32_85], %295 {strides = array<i32>} : memref<64x64xf32, #tpu.memory_space<vmem>>, vector<8x32xf32>,
    %c56_86 = arith.constant 56 : index
    %c0_87 = arith.constant 0 : index
    %298 = vector.load %arg12[%c56_86, %c0_87] : memref<64x256xf32, #tpu.memory_space<vmem>>, vector<8x128xf32>
    %c0_88 = arith.constant 0 : index
    %c128_89 = arith.constant 128 : index
    %299 = vector.load %arg12[%c0_88, %c128_89] : memref<64x256xf32, #tpu.memory_space<vmem>>, vector<8x128xf32>
    %300 = arith.truncf %279 : vector<8x32xf32> to vector<8x32xbf16>
    %cst_90 = arith.constant dense<0.000000e+00> : vector<8x128xf32>
    %301 = tpu.matmul %300, %7, %cst_90 {dimension_numbers = #tpu.dot_dimension_numbers<[1], [0], [0], [1], [0, 0, 1, 1], [], []>} : vector<8x32xbf16>, vector<32x128xbf16>, vector<8x128xf32> -> vector<8x128xf32>
    %302 = arith.addf %298, %301 : vector<8x128xf32>
    %303 = arith.truncf %295 : vector<8x32xf32> to vector<8x32xbf16>
    %cst_91 = arith.constant dense<0.000000e+00> : vector<8x128xf32>
    %304 = tpu.matmul %303, %8, %cst_91 {dimension_numbers = #tpu.dot_dimension_numbers<[1], [0], [0], [1], [0, 0, 1, 1], [], []>} : vector<8x32xbf16>, vector<32x128xbf16>, vector<8x128xf32> -> vector<8x128xf32>
    %305 = arith.addf %299, %304 : vector<8x128xf32>
    %306 = vector.extract_strided_slice %302 {offsets = [0, 0], sizes = [8, 96], strides = [1, 1]} : vector<8x128xf32> to vector<8x96xf32>
    %307 = arith.negf %306 : vector<8x96xf32>
    %308 = math.exp %307 : vector<8x96xf32>
    %cst_92 = arith.constant 1.000000e+00 : f32
    %309 = vector.broadcast %cst_92 : f32 to vector<8x96xf32>
    %310 = arith.addf %309, %308 : vector<8x96xf32>
    %311 = arith.divf %309, %310 : vector<8x96xf32>
    %312 = vector.extract_strided_slice %302 {offsets = [0, 96], sizes = [8, 32], strides = [1, 1]} : vector<8x128xf32> to vector<8x32xf32>
    %313 = math.tanh %312 : vector<8x32xf32>
    %314 = vector.extract_strided_slice %311 {offsets = [0, 0], sizes = [8, 32], strides = [1, 1]} : vector<8x96xf32> to vector<8x32xf32>
    %315 = vector.extract_strided_slice %311 {offsets = [0, 32], sizes = [8, 32], strides = [1, 1]} : vector<8x96xf32> to vector<8x32xf32>
    %316 = vector.extract_strided_slice %311 {offsets = [0, 64], sizes = [8, 32], strides = [1, 1]} : vector<8x96xf32> to vector<8x32xf32>
    %317 = arith.mulf %315, %277 : vector<8x32xf32>
    %318 = arith.mulf %314, %313 : vector<8x32xf32>
    %319 = arith.addf %317, %318 : vector<8x32xf32>
    %320 = math.tanh %319 : vector<8x32xf32>
    %321 = arith.mulf %316, %320 : vector<8x32xf32>
    %322 = vector.extract_strided_slice %305 {offsets = [0, 0], sizes = [8, 96], strides = [1, 1]} : vector<8x128xf32> to vector<8x96xf32>
    %323 = arith.negf %322 : vector<8x96xf32>
    %324 = math.exp %323 : vector<8x96xf32>
    %cst_93 = arith.constant 1.000000e+00 : f32
    %325 = vector.broadcast %cst_93 : f32 to vector<8x96xf32>
    %326 = arith.addf %325, %324 : vector<8x96xf32>
    %327 = arith.divf %325, %326 : vector<8x96xf32>
    %328 = vector.extract_strided_slice %305 {offsets = [0, 96], sizes = [8, 32], strides = [1, 1]} : vector<8x128xf32> to vector<8x32xf32>
    %329 = math.tanh %328 : vector<8x32xf32>
    %330 = vector.extract_strided_slice %327 {offsets = [0, 0], sizes = [8, 32], strides = [1, 1]} : vector<8x96xf32> to vector<8x32xf32>
    %331 = vector.extract_strided_slice %327 {offsets = [0, 32], sizes = [8, 32], strides = [1, 1]} : vector<8x96xf32> to vector<8x32xf32>
    %332 = vector.extract_strided_slice %327 {offsets = [0, 64], sizes = [8, 32], strides = [1, 1]} : vector<8x96xf32> to vector<8x32xf32>
    %333 = arith.mulf %331, %293 : vector<8x32xf32>
    %334 = arith.mulf %330, %329 : vector<8x32xf32>
    %335 = arith.addf %333, %334 : vector<8x32xf32>
    %336 = math.tanh %335 : vector<8x32xf32>
    %337 = arith.mulf %332, %336 : vector<8x32xf32>
    %c56_94 = arith.constant 56 : index
    %c0_95 = arith.constant 0 : index
    %338 = vector.load %arg13[%c56_94, %c0_95] : memref<64x64xf32, #tpu.memory_space<vmem>>, vector<8x32xf32>
    tpu.vector_store %arg13[%c56_94, %c0_95], %321 {strides = array<i32>} : memref<64x64xf32, #tpu.memory_space<vmem>>, vector<8x32xf32>,
    %c0_96 = arith.constant 0 : index
    %c32_97 = arith.constant 32 : index
    %339 = vector.load %arg13[%c0_96, %c32_97] : memref<64x64xf32, #tpu.memory_space<vmem>>, vector<8x32xf32>
    tpu.vector_store %arg13[%c0_96, %c32_97], %337 {strides = array<i32>} : memref<64x64xf32, #tpu.memory_space<vmem>>, vector<8x32xf32>,
    %c0_98 = arith.constant 0 : index
    %c0_99 = arith.constant 0 : index
    %340 = vector.load %arg13[%c0_98, %c0_99] : memref<64x64xf32, #tpu.memory_space<vmem>>, vector<64x64xf32>
    %341 = arith.truncf %340 : vector<64x64xf32> to vector<64x64xbf16>
    %c0_100 = arith.constant 0 : index
    %c0_101 = arith.constant 0 : index
    %342 = vector.load %arg5[%c0_100, %c0_101] : memref<64x256xbf16, #tpu.memory_space<vmem>>, vector<64x256xbf16>
    %cst_102 = arith.constant dense<0.000000e+00> : vector<64x256xf32>
    %343 = tpu.matmul %341, %342, %cst_102 {dimension_numbers = #tpu.dot_dimension_numbers<[1], [0], [0], [1], [0, 0, 1, 1], [], []>} : vector<64x64xbf16>, vector<64x256xbf16>, vector<64x256xf32> -> vector<64x256xf32>
    %c0_103 = arith.constant 0 : index
    %c0_104 = arith.constant 0 : index
    %344 = vector.load %arg8[%c0_103, %c0_104] : memref<1x256xf32, #tpu.memory_space<vmem>>, vector<1x256xf32>
    %345 = vector.broadcast %344 : vector<1x256xf32> to vector<64x256xf32>
    %346 = arith.addf %343, %345 : vector<64x256xf32>
    %c0_105 = arith.constant 0 : index
    %c0_106 = arith.constant 0 : index
    %347 = vector.load %arg12[%c0_105, %c0_106] : memref<64x256xf32, #tpu.memory_space<vmem>>, vector<64x256xf32>
    tpu.vector_store %arg12[%c0_105, %c0_106], %346 {strides = array<i32>} : memref<64x256xf32, #tpu.memory_space<vmem>>, vector<64x256xf32>,
    %c0_107 = arith.constant 0 : index
    %c0_108 = arith.constant 0 : index
    %348 = vector.load %arg6[%c0_107, %c0_108] : memref<32x128xbf16, #tpu.memory_space<vmem>>, vector<32x128xbf16>
    %cst_109 = arith.constant 0.000000e+00 : f32
    %349 = vector.broadcast %cst_109 : f32 to vector<8x32xf32>
    %c0_110 = arith.constant 0 : index
    %c0_111 = arith.constant 0 : index
    %350 = vector.load %arg12[%c0_110, %c0_111] : memref<64x256xf32, #tpu.memory_space<vmem>>, vector<8x128xf32>
    %c56_112 = arith.constant 56 : index
    %c128_113 = arith.constant 128 : index
    %351 = vector.load %arg12[%c56_112, %c128_113] : memref<64x256xf32, #tpu.memory_space<vmem>>, vector<8x128xf32>
    %352 = vector.extract_strided_slice %350 {offsets = [0, 0], sizes = [8, 96], strides = [1, 1]} : vector<8x128xf32> to vector<8x96xf32>
    %353 = arith.negf %352 : vector<8x96xf32>
    %354 = math.exp %353 : vector<8x96xf32>
    %cst_114 = arith.constant 1.000000e+00 : f32
    %355 = vector.broadcast %cst_114 : f32 to vector<8x96xf32>
    %356 = arith.addf %355, %354 : vector<8x96xf32>
    %357 = arith.divf %355, %356 : vector<8x96xf32>
    %358 = vector.extract_strided_slice %350 {offsets = [0, 96], sizes = [8, 32], strides = [1, 1]} : vector<8x128xf32> to vector<8x32xf32>
    %359 = math.tanh %358 : vector<8x32xf32>
    %360 = vector.extract_strided_slice %357 {offsets = [0, 0], sizes = [8, 32], strides = [1, 1]} : vector<8x96xf32> to vector<8x32xf32>
    %361 = vector.extract_strided_slice %357 {offsets = [0, 32], sizes = [8, 32], strides = [1, 1]} : vector<8x96xf32> to vector<8x32xf32>
    %362 = vector.extract_strided_slice %357 {offsets = [0, 64], sizes = [8, 32], strides = [1, 1]} : vector<8x96xf32> to vector<8x32xf32>
    %363 = arith.mulf %361, %349 : vector<8x32xf32>
    %364 = arith.mulf %360, %359 : vector<8x32xf32>
    %365 = arith.addf %363, %364 : vector<8x32xf32>
    %366 = math.tanh %365 : vector<8x32xf32>
    %367 = arith.mulf %362, %366 : vector<8x32xf32>
    %368 = vector.extract_strided_slice %351 {offsets = [0, 0], sizes = [8, 96], strides = [1, 1]} : vector<8x128xf32> to vector<8x96xf32>
    %369 = arith.negf %368 : vector<8x96xf32>
    %370 = math.exp %369 : vector<8x96xf32>
    %cst_115 = arith.constant 1.000000e+00 : f32
    %371 = vector.broadcast %cst_115 : f32 to vector<8x96xf32>
    %372 = arith.addf %371, %370 : vector<8x96xf32>
    %373 = arith.divf %371, %372 : vector<8x96xf32>
    %374 = vector.extract_strided_slice %351 {offsets = [0, 96], sizes = [8, 32], strides = [1, 1]} : vector<8x128xf32> to vector<8x32xf32>
    %375 = math.tanh %374 : vector<8x32xf32>
    %376 = vector.extract_strided_slice %373 {offsets = [0, 0], sizes = [8, 32], strides = [1, 1]} : vector<8x96xf32> to vector<8x32xf32>
    %377 = vector.extract_strided_slice %373 {offsets = [0, 32], sizes = [8, 32], strides = [1, 1]} : vector<8x96xf32> to vector<8x32xf32>
    %378 = vector.extract_strided_slice %373 {offsets = [0, 64], sizes = [8, 32], strides = [1, 1]} : vector<8x96xf32> to vector<8x32xf32>
    %379 = arith.mulf %377, %349 : vector<8x32xf32>
    %380 = arith.mulf %376, %375 : vector<8x32xf32>
    %381 = arith.addf %379, %380 : vector<8x32xf32>
    %382 = math.tanh %381 : vector<8x32xf32>
    %383 = arith.mulf %378, %382 : vector<8x32xf32>
    %c8_116 = arith.constant 8 : index
    %c0_117 = arith.constant 0 : index
    %384 = vector.load %arg12[%c8_116, %c0_117] : memref<64x256xf32, #tpu.memory_space<vmem>>, vector<8x128xf32>
    %385 = arith.truncf %367 : vector<8x32xf32> to vector<8x32xbf16>
    %cst_118 = arith.constant dense<0.000000e+00> : vector<8x128xf32>
    %386 = tpu.matmul %385, %348, %cst_118 {dimension_numbers = #tpu.dot_dimension_numbers<[1], [0], [0], [1], [0, 0, 1, 1], [], []>} : vector<8x32xbf16>, vector<32x128xbf16>, vector<8x128xf32> -> vector<8x128xf32>
    %387 = arith.addf %384, %386 : vector<8x128xf32>
    %388 = vector.extract_strided_slice %387 {offsets = [0, 0], sizes = [8, 96], strides = [1, 1]} : vector<8x128xf32> to vector<8x96xf32>
    %389 = arith.negf %388 : vector<8x96xf32>
    %390 = math.exp %389 : vector<8x96xf32>
    %cst_119 = arith.constant 1.000000e+00 : f32
    %391 = vector.broadcast %cst_119 : f32 to vector<8x96xf32>
    %392 = arith.addf %391, %390 : vector<8x96xf32>
    %393 = arith.divf %391, %392 : vector<8x96xf32>
    %394 = vector.extract_strided_slice %387 {offsets = [0, 96], sizes = [8, 32], strides = [1, 1]} : vector<8x128xf32> to vector<8x32xf32>
    %395 = math.tanh %394 : vector<8x32xf32>
    %396 = vector.extract_strided_slice %393 {offsets = [0, 0], sizes = [8, 32], strides = [1, 1]} : vector<8x96xf32> to vector<8x32xf32>
    %397 = vector.extract_strided_slice %393 {offsets = [0, 32], sizes = [8, 32], strides = [1, 1]} : vector<8x96xf32> to vector<8x32xf32>
    %398 = vector.extract_strided_slice %393 {offsets = [0, 64], sizes = [8, 32], strides = [1, 1]} : vector<8x96xf32> to vector<8x32xf32>
    %399 = arith.mulf %397, %365 : vector<8x32xf32>
    %400 = arith.mulf %396, %395 : vector<8x32xf32>
    %401 = arith.addf %399, %400 : vector<8x32xf32>
    %402 = math.tanh %401 : vector<8x32xf32>
    %403 = arith.mulf %398, %402 : vector<8x32xf32>
    %c16_120 = arith.constant 16 : index
    %c0_121 = arith.constant 0 : index
    %404 = vector.load %arg12[%c16_120, %c0_121] : memref<64x256xf32, #tpu.memory_space<vmem>>, vector<8x128xf32>
    %405 = arith.truncf %403 : vector<8x32xf32> to vector<8x32xbf16>
    %cst_122 = arith.constant dense<0.000000e+00> : vector<8x128xf32>
    %406 = tpu.matmul %405, %348, %cst_122 {dimension_numbers = #tpu.dot_dimension_numbers<[1], [0], [0], [1], [0, 0, 1, 1], [], []>} : vector<8x32xbf16>, vector<32x128xbf16>, vector<8x128xf32> -> vector<8x128xf32>
    %407 = arith.addf %404, %406 : vector<8x128xf32>
    %408 = vector.extract_strided_slice %407 {offsets = [0, 0], sizes = [8, 96], strides = [1, 1]} : vector<8x128xf32> to vector<8x96xf32>
    %409 = arith.negf %408 : vector<8x96xf32>
    %410 = math.exp %409 : vector<8x96xf32>
    %cst_123 = arith.constant 1.000000e+00 : f32
    %411 = vector.broadcast %cst_123 : f32 to vector<8x96xf32>
    %412 = arith.addf %411, %410 : vector<8x96xf32>
    %413 = arith.divf %411, %412 : vector<8x96xf32>
    %414 = vector.extract_strided_slice %407 {offsets = [0, 96], sizes = [8, 32], strides = [1, 1]} : vector<8x128xf32> to vector<8x32xf32>
    %415 = math.tanh %414 : vector<8x32xf32>
    %416 = vector.extract_strided_slice %413 {offsets = [0, 0], sizes = [8, 32], strides = [1, 1]} : vector<8x96xf32> to vector<8x32xf32>
    %417 = vector.extract_strided_slice %413 {offsets = [0, 32], sizes = [8, 32], strides = [1, 1]} : vector<8x96xf32> to vector<8x32xf32>
    %418 = vector.extract_strided_slice %413 {offsets = [0, 64], sizes = [8, 32], strides = [1, 1]} : vector<8x96xf32> to vector<8x32xf32>
    %419 = arith.mulf %417, %401 : vector<8x32xf32>
    %420 = arith.mulf %416, %415 : vector<8x32xf32>
    %421 = arith.addf %419, %420 : vector<8x32xf32>
    %422 = math.tanh %421 : vector<8x32xf32>
    %423 = arith.mulf %418, %422 : vector<8x32xf32>
    %c24_124 = arith.constant 24 : index
    %c0_125 = arith.constant 0 : index
    %424 = vector.load %arg12[%c24_124, %c0_125] : memref<64x256xf32, #tpu.memory_space<vmem>>, vector<8x128xf32>
    %425 = arith.truncf %423 : vector<8x32xf32> to vector<8x32xbf16>
    %cst_126 = arith.constant dense<0.000000e+00> : vector<8x128xf32>
    %426 = tpu.matmul %425, %348, %cst_126 {dimension_numbers = #tpu.dot_dimension_numbers<[1], [0], [0], [1], [0, 0, 1, 1], [], []>} : vector<8x32xbf16>, vector<32x128xbf16>, vector<8x128xf32> -> vector<8x128xf32>
    %427 = arith.addf %424, %426 : vector<8x128xf32>
    %428 = vector.extract_strided_slice %427 {offsets = [0, 0], sizes = [8, 96], strides = [1, 1]} : vector<8x128xf32> to vector<8x96xf32>
    %429 = arith.negf %428 : vector<8x96xf32>
    %430 = math.exp %429 : vector<8x96xf32>
    %cst_127 = arith.constant 1.000000e+00 : f32
    %431 = vector.broadcast %cst_127 : f32 to vector<8x96xf32>
    %432 = arith.addf %431, %430 : vector<8x96xf32>
    %433 = arith.divf %431, %432 : vector<8x96xf32>
    %434 = vector.extract_strided_slice %427 {offsets = [0, 96], sizes = [8, 32], strides = [1, 1]} : vector<8x128xf32> to vector<8x32xf32>
    %435 = math.tanh %434 : vector<8x32xf32>
    %436 = vector.extract_strided_slice %433 {offsets = [0, 0], sizes = [8, 32], strides = [1, 1]} : vector<8x96xf32> to vector<8x32xf32>
    %437 = vector.extract_strided_slice %433 {offsets = [0, 32], sizes = [8, 32], strides = [1, 1]} : vector<8x96xf32> to vector<8x32xf32>
    %438 = vector.extract_strided_slice %433 {offsets = [0, 64], sizes = [8, 32], strides = [1, 1]} : vector<8x96xf32> to vector<8x32xf32>
    %439 = arith.mulf %437, %421 : vector<8x32xf32>
    %440 = arith.mulf %436, %435 : vector<8x32xf32>
    %441 = arith.addf %439, %440 : vector<8x32xf32>
    %442 = math.tanh %441 : vector<8x32xf32>
    %443 = arith.mulf %438, %442 : vector<8x32xf32>
    %c32_128 = arith.constant 32 : index
    %c0_129 = arith.constant 0 : index
    %444 = vector.load %arg12[%c32_128, %c0_129] : memref<64x256xf32, #tpu.memory_space<vmem>>, vector<8x128xf32>
    %445 = arith.truncf %443 : vector<8x32xf32> to vector<8x32xbf16>
    %cst_130 = arith.constant dense<0.000000e+00> : vector<8x128xf32>
    %446 = tpu.matmul %445, %348, %cst_130 {dimension_numbers = #tpu.dot_dimension_numbers<[1], [0], [0], [1], [0, 0, 1, 1], [], []>} : vector<8x32xbf16>, vector<32x128xbf16>, vector<8x128xf32> -> vector<8x128xf32>
    %447 = arith.addf %444, %446 : vector<8x128xf32>
    %448 = vector.extract_strided_slice %447 {offsets = [0, 0], sizes = [8, 96], strides = [1, 1]} : vector<8x128xf32> to vector<8x96xf32>
    %449 = arith.negf %448 : vector<8x96xf32>
    %450 = math.exp %449 : vector<8x96xf32>
    %cst_131 = arith.constant 1.000000e+00 : f32
    %451 = vector.broadcast %cst_131 : f32 to vector<8x96xf32>
    %452 = arith.addf %451, %450 : vector<8x96xf32>
    %453 = arith.divf %451, %452 : vector<8x96xf32>
    %454 = vector.extract_strided_slice %447 {offsets = [0, 96], sizes = [8, 32], strides = [1, 1]} : vector<8x128xf32> to vector<8x32xf32>
    %455 = math.tanh %454 : vector<8x32xf32>
    %456 = vector.extract_strided_slice %453 {offsets = [0, 0], sizes = [8, 32], strides = [1, 1]} : vector<8x96xf32> to vector<8x32xf32>
    %457 = vector.extract_strided_slice %453 {offsets = [0, 32], sizes = [8, 32], strides = [1, 1]} : vector<8x96xf32> to vector<8x32xf32>
    %458 = vector.extract_strided_slice %453 {offsets = [0, 64], sizes = [8, 32], strides = [1, 1]} : vector<8x96xf32> to vector<8x32xf32>
    %459 = arith.mulf %457, %441 : vector<8x32xf32>
    %460 = arith.mulf %456, %455 : vector<8x32xf32>
    %461 = arith.addf %459, %460 : vector<8x32xf32>
    %462 = math.tanh %461 : vector<8x32xf32>
    %463 = arith.mulf %458, %462 : vector<8x32xf32>
    %c40_132 = arith.constant 40 : index
    %c0_133 = arith.constant 0 : index
    %464 = vector.load %arg12[%c40_132, %c0_133] : memref<64x256xf32, #tpu.memory_space<vmem>>, vector<8x128xf32>
    %465 = arith.truncf %463 : vector<8x32xf32> to vector<8x32xbf16>
    %cst_134 = arith.constant dense<0.000000e+00> : vector<8x128xf32>
    %466 = tpu.matmul %465, %348, %cst_134 {dimension_numbers = #tpu.dot_dimension_numbers<[1], [0], [0], [1], [0, 0, 1, 1], [], []>} : vector<8x32xbf16>, vector<32x128xbf16>, vector<8x128xf32> -> vector<8x128xf32>
    %467 = arith.addf %464, %466 : vector<8x128xf32>
    %468 = vector.extract_strided_slice %467 {offsets = [0, 0], sizes = [8, 96], strides = [1, 1]} : vector<8x128xf32> to vector<8x96xf32>
    %469 = arith.negf %468 : vector<8x96xf32>
    %470 = math.exp %469 : vector<8x96xf32>
    %cst_135 = arith.constant 1.000000e+00 : f32
    %471 = vector.broadcast %cst_135 : f32 to vector<8x96xf32>
    %472 = arith.addf %471, %470 : vector<8x96xf32>
    %473 = arith.divf %471, %472 : vector<8x96xf32>
    %474 = vector.extract_strided_slice %467 {offsets = [0, 96], sizes = [8, 32], strides = [1, 1]} : vector<8x128xf32> to vector<8x32xf32>
    %475 = math.tanh %474 : vector<8x32xf32>
    %476 = vector.extract_strided_slice %473 {offsets = [0, 0], sizes = [8, 32], strides = [1, 1]} : vector<8x96xf32> to vector<8x32xf32>
    %477 = vector.extract_strided_slice %473 {offsets = [0, 32], sizes = [8, 32], strides = [1, 1]} : vector<8x96xf32> to vector<8x32xf32>
    %478 = vector.extract_strided_slice %473 {offsets = [0, 64], sizes = [8, 32], strides = [1, 1]} : vector<8x96xf32> to vector<8x32xf32>
    %479 = arith.mulf %477, %461 : vector<8x32xf32>
    %480 = arith.mulf %476, %475 : vector<8x32xf32>
    %481 = arith.addf %479, %480 : vector<8x32xf32>
    %482 = math.tanh %481 : vector<8x32xf32>
    %483 = arith.mulf %478, %482 : vector<8x32xf32>
    %c48_136 = arith.constant 48 : index
    %c0_137 = arith.constant 0 : index
    %484 = vector.load %arg12[%c48_136, %c0_137] : memref<64x256xf32, #tpu.memory_space<vmem>>, vector<8x128xf32>
    %485 = arith.truncf %483 : vector<8x32xf32> to vector<8x32xbf16>
    %cst_138 = arith.constant dense<0.000000e+00> : vector<8x128xf32>
    %486 = tpu.matmul %485, %348, %cst_138 {dimension_numbers = #tpu.dot_dimension_numbers<[1], [0], [0], [1], [0, 0, 1, 1], [], []>} : vector<8x32xbf16>, vector<32x128xbf16>, vector<8x128xf32> -> vector<8x128xf32>
    %487 = arith.addf %484, %486 : vector<8x128xf32>
    %488 = vector.extract_strided_slice %487 {offsets = [0, 0], sizes = [8, 96], strides = [1, 1]} : vector<8x128xf32> to vector<8x96xf32>
    %489 = arith.negf %488 : vector<8x96xf32>
    %490 = math.exp %489 : vector<8x96xf32>
    %cst_139 = arith.constant 1.000000e+00 : f32
    %491 = vector.broadcast %cst_139 : f32 to vector<8x96xf32>
    %492 = arith.addf %491, %490 : vector<8x96xf32>
    %493 = arith.divf %491, %492 : vector<8x96xf32>
    %494 = vector.extract_strided_slice %487 {offsets = [0, 96], sizes = [8, 32], strides = [1, 1]} : vector<8x128xf32> to vector<8x32xf32>
    %495 = math.tanh %494 : vector<8x32xf32>
    %496 = vector.extract_strided_slice %493 {offsets = [0, 0], sizes = [8, 32], strides = [1, 1]} : vector<8x96xf32> to vector<8x32xf32>
    %497 = vector.extract_strided_slice %493 {offsets = [0, 32], sizes = [8, 32], strides = [1, 1]} : vector<8x96xf32> to vector<8x32xf32>
    %498 = vector.extract_strided_slice %493 {offsets = [0, 64], sizes = [8, 32], strides = [1, 1]} : vector<8x96xf32> to vector<8x32xf32>
    %499 = arith.mulf %497, %481 : vector<8x32xf32>
    %500 = arith.mulf %496, %495 : vector<8x32xf32>
    %501 = arith.addf %499, %500 : vector<8x32xf32>
    %502 = math.tanh %501 : vector<8x32xf32>
    %503 = arith.mulf %498, %502 : vector<8x32xf32>
    %c56_140 = arith.constant 56 : index
    %c0_141 = arith.constant 0 : index
    %504 = vector.load %arg12[%c56_140, %c0_141] : memref<64x256xf32, #tpu.memory_space<vmem>>, vector<8x128xf32>
    %505 = arith.truncf %503 : vector<8x32xf32> to vector<8x32xbf16>
    %cst_142 = arith.constant dense<0.000000e+00> : vector<8x128xf32>
    %506 = tpu.matmul %505, %348, %cst_142 {dimension_numbers = #tpu.dot_dimension_numbers<[1], [0], [0], [1], [0, 0, 1, 1], [], []>} : vector<8x32xbf16>, vector<32x128xbf16>, vector<8x128xf32> -> vector<8x128xf32>
    %507 = arith.addf %504, %506 : vector<8x128xf32>
    %508 = vector.extract_strided_slice %507 {offsets = [0, 0], sizes = [8, 96], strides = [1, 1]} : vector<8x128xf32> to vector<8x96xf32>
    %509 = arith.negf %508 : vector<8x96xf32>
    %510 = math.exp %509 : vector<8x96xf32>
    %cst_143 = arith.constant 1.000000e+00 : f32
    %511 = vector.broadcast %cst_143 : f32 to vector<8x96xf32>
    %512 = arith.addf %511, %510 : vector<8x96xf32>
    %513 = arith.divf %511, %512 : vector<8x96xf32>
    %514 = vector.extract_strided_slice %507 {offsets = [0, 96], sizes = [8, 32], strides = [1, 1]} : vector<8x128xf32> to vector<8x32xf32>
    %515 = math.tanh %514 : vector<8x32xf32>
    %516 = vector.extract_strided_slice %513 {offsets = [0, 0], sizes = [8, 32], strides = [1, 1]} : vector<8x96xf32> to vector<8x32xf32>
    %517 = vector.extract_strided_slice %513 {offsets = [0, 32], sizes = [8, 32], strides = [1, 1]} : vector<8x96xf32> to vector<8x32xf32>
    %518 = vector.extract_strided_slice %513 {offsets = [0, 64], sizes = [8, 32], strides = [1, 1]} : vector<8x96xf32> to vector<8x32xf32>
    %519 = arith.mulf %517, %501 : vector<8x32xf32>
    %520 = arith.mulf %516, %515 : vector<8x32xf32>
    %521 = arith.addf %519, %520 : vector<8x32xf32>
    %522 = math.tanh %521 : vector<8x32xf32>
    %523 = arith.mulf %518, %522 : vector<8x32xf32>
    %524 = tpu.concatenate %523, %383 in 1 : vector<8x32xf32>, vector<8x32xf32> -> vector<8x64xf32>
    %525 = arith.truncf %524 : vector<8x64xf32> to vector<8x64xbf16>
    %c0_144 = arith.constant 0 : index
    %c0_145 = arith.constant 0 : index
    %526 = vector.load %arg9[%c0_144, %c0_145] : memref<64x15xbf16, #tpu.memory_space<vmem>>, vector<64x15xbf16>
    %cst_146 = arith.constant dense<0.000000e+00> : vector<8x15xf32>
    %527 = tpu.matmul %525, %526, %cst_146 {dimension_numbers = #tpu.dot_dimension_numbers<[1], [0], [0], [1], [0, 0, 1, 1], [], []>} : vector<8x64xbf16>, vector<64x15xbf16>, vector<8x15xf32> -> vector<8x15xf32>
    %c0_147 = arith.constant 0 : index
    %c0_148 = arith.constant 0 : index
    %528 = vector.load %arg10[%c0_147, %c0_148] : memref<1x15xf32, #tpu.memory_space<vmem>>, vector<1x15xf32>
    %529 = vector.broadcast %528 : vector<1x15xf32> to vector<8x15xf32>
    %530 = arith.addf %527, %529 : vector<8x15xf32>
    %c0_149 = arith.constant 0 : index
    %c0_150 = arith.constant 0 : index
    %531 = vector.load %arg11[%c0_149, %c0_150] : memref<8x15xf32, #tpu.memory_space<vmem>>, vector<8x15xf32>
    tpu.vector_store %arg11[%c0_149, %c0_150], %530 {strides = array<i32>} : memref<8x15xf32, #tpu.memory_space<vmem>>, vector<8x15xf32>,
    return
  }
}

</mosaic_0001>

<bundles_post_ra>
// kernel: tpu_custom_call.1
= control target key start
LH: loop header
LB: loop body
LE: loop exit
PB: predicated region body
PF: predicated region fallthrough
CT: control target
= control target key end

     0   :  { %16 = vsyncpa [#allocation5], 0  ;;  %s3681_s0 = inlined_call_operand.vmem [shape: bf16[64,15], index: 0, kind: input, shape index: {}]   ;;  %s3682_s1 = inlined_call_operand.vmem [shape: bf16[15,256], index: 1, kind: input, shape index: {}]   ;;  %s3683_s2 = inlined_call_operand.vmem [shape: bf16[32,128], index: 2, kind: input, shape index: {}]   ;;  %s3684_s3 = inlined_call_operand.hbm [shape: bf16[32,128], index: 3, kind: input, shape index: {}]   ;;  %s3685_s4 = inlined_call_operand.vmem [shape: f32[1,256], index: 4, kind: input, shape index: {}]   ;;  %s3686_s5 = inlined_call_operand.vmem [shape: bf16[64,256], index: 5, kind: input, shape index: {}]   ;;  %s3687_s6 = inlined_call_operand.hbm [shape: bf16[32,128], index: 6, kind: input, shape index: {}]   ;;  %s3688_s7 = inlined_call_operand.hbm [shape: bf16[32,128], index: 7, kind: input, shape index: {}]   ;;  %s3689_s8 = inlined_call_operand.vmem [shape: f32[1,256], index: 8, kind: input, shape index: {}]   ;;  %s3690_s9 = inlined_call_operand.vmem [shape: bf16[64,15], index: 9, kind: input, shape index: {}]   ;;  %s3691_s10 = inlined_call_operand.vmem [shape: f32[1,15], index: 10, kind: input, shape index: {}]   ;;  %s3692_s11 = inlined_call_operand.hbm [shape: f32[8,15], index: 11, kind: output, shape index: {}]  }
   0x1   :  { %17 = vsyncpa [#allocation8], 0 }
   0x2   :  { %18 = vsyncpa [#allocation6], 0  ;;  %s2954_s17 = smov [#allocation7]   ;;  %s2955_s19 = smov [#allocation4]  }
   0x3   :  { %s46_s18 = sshll.u32 %s2954_s17, 4  ;;  %s30_s20 = sshll.u32 %s2955_s19, 4  ;;  %s47_s18 = int_to_ptr.vmem [resolvable:$true] %s46_s18  ;;  %s3026_s20 = int_to_ptr.vmem [resolvable:$true] %s30_s20 }
   0x4   :  { %s2860_s23 = scalar_lea.hbm %s3687_s6, 256 }
   0x5   :  { %p2861_p0 = scmp.ne.s32.totalorder %s3687_s6, %s2860_s23  ;;  %p2864_p1 = scmp.lt.u32.totalorder %s2860_s23, %s3687_s6 }
   0x7   :  { %p2866_p2 = pnand %p2864_p1, %p2861_p0 }
   0x9   :  { %2869 = shalt.err (!%p2866_p2)
}
   0xa   :  { %s2870_s28 = scalar_lea.vmem %s47_s18, 256  ;;  %p2875_p4 = scmp.lt.s32.totalorder %s47_s18, %s47_s18 }
   0xb   :  { %p2871_p3 = scmp.ne.s32.totalorder %s47_s18, %s2870_s28  ;;  %p2876_p5 = scmp.lt.s32.totalorder %s2870_s28, %s2870_s28 }
   0xd   :  { %p2877_p6 = por %p2876_p5, %p2875_p4 }
   0xf   :  { %p2878_p7 = pnand %p2877_p6, %p2871_p3 }
  0x11   :  { %2881 = shalt.err (!%p2878_p7)
}
  0x12   :  { %s2956_s29 = smov 64   ;;  %s2957_s30 = smov 4  }
  0x13   :  { %52 = dma.hbm_to_vmem [thread:$0]  %s3687_s6, 256, %s47_s18, [#allocation8], %s2956_s29, %s2956_s29, %s2957_s30  }
  0x14   :  { %s2882_s16 = scalar_lea.hbm %s3684_s3, 256 }
  0x15   :  { %p2883_p8 = scmp.ne.s32.totalorder %s3684_s3, %s2882_s16  ;;  %p2886_p9 = scmp.lt.u32.totalorder %s2882_s16, %s3684_s3 }
  0x17   :  { %p2888_p10 = pnand %p2886_p9, %p2883_p8 }
  0x19   :  { %2891 = shalt.err (!%p2888_p10)
}
  0x1a   :  { %s2892_s23 = scalar_lea.vmem %s3026_s20, 256  ;;  %p2897_p12 = scmp.lt.s32.totalorder %s3026_s20, %s3026_s20 }
  0x1b   :  { %p2893_p11 = scmp.ne.s32.totalorder %s3026_s20, %s2892_s23  ;;  %p2898_p13 = scmp.lt.s32.totalorder %s2892_s23, %s2892_s23 }
  0x1d   :  { %p2899_p0 = por %p2898_p13, %p2897_p12 }
  0x1f   :  { %p2900_p1 = pnand %p2899_p0, %p2893_p11 }
  0x21   :  { %2903 = shalt.err (!%p2900_p1)
}
  0x22   :  { %36 = dma.hbm_to_vmem [thread:$0]  %s3684_s3, 256, %s3026_s20, [#allocation5], %s2956_s29, %s2956_s29, %s2957_s30  }
  0x23   :  { %s2958_s24 = smov [#allocation9]   ;;  %s2904_s28 = scalar_lea.hbm %s3688_s7, 256 }
  0x24   :  { %s58_s25 = sshll.u32 %s2958_s24, 4  ;;  %p2905_p2 = scmp.ne.s32.totalorder %s3688_s7, %s2904_s28  ;;  %s59_s25 = int_to_ptr.vmem [resolvable:$true] %s58_s25 }
  0x25   :  { %p2908_p3 = scmp.lt.u32.totalorder %s2904_s28, %s3688_s7 }
  0x27   :  { %p2910_p4 = pnand %p2908_p3, %p2905_p2 }
  0x29   :  { %2913 = shalt.err (!%p2910_p4)
}
  0x2a   :  { %s2914_s16 = scalar_lea.vmem %s59_s25, 256  ;;  %p2919_p6 = scmp.lt.s32.totalorder %s59_s25, %s59_s25 }
  0x2b   :  { %p2915_p5 = scmp.ne.s32.totalorder %s59_s25, %s2914_s16  ;;  %p2920_p7 = scmp.lt.s32.totalorder %s2914_s16, %s2914_s16 }
  0x2d   :  { %p2921_p8 = por %p2920_p7, %p2919_p6 }
  0x2f   :  { %p2922_p9 = pnand %p2921_p8, %p2915_p5 }
  0x31   :  { %2925 = shalt.err (!%p2922_p9)
}
  0x32   :  { %64 = dma.hbm_to_vmem [thread:$0]  %s3688_s7, 256, %s59_s25, [#allocation8], %s2956_s29, %s2956_s29, %s2957_s30  }
  0x33   :  { %2948 = dma.done.wait [#allocation5], 256  }
  0x34   :  { %2949 = vsyncadd [#allocation5], 4294967040 }
  0x35   :  { %2950 = dma.done.wait [#allocation8], 512  }
  0x36   :  { %2951 = vsyncadd [#allocation8], 4294966784  ;;  %vm144_vm0 = vcmask 1046528   ;;  %v2959_v0 = vmov 0   ;;  %vm145_vm1 = vcmask 1047552   ;;  %v2960_v1 = vmov 65535  }
  0x37   :  { %186 = vmatprep.mubr.bf16.mxu0 %v2959_v0  ;;  %216 = vmatprep.mubr.bf16.mxu1 %v2959_v0  ;;  %v146_v2 = vsel %vm144_vm0, 4294967295, %v2960_v1  ;;  %v2631_v4 = vld [vmem:[%s3682_s1 + $0x4] ss:$8 sps:$4 sm:$0xff]   ;;  %v2633_v5 = vld [vmem:[%s3682_s1] ss:$8 sps:$4 sm:$0xff]   ;;  %vm131_vm2 = vcmask 121856   ;;  %v93_v10 = vlaneseq }
  0x38   :  { %v147_v3 = vsel %vm145_vm1, %v146_v2, 0  ;;  %v2634_v8 = vld [vmem:[%s3681_s0] sm:$0xff]   ;;  %v2635_v9 = vld [vmem:[%s3681_s0 + $0x18] sm:$0xff]   ;;  %v2962_v48 = vmov 0.0   ;;  %vm2963_vm3 = vmmov 0   ;;  %v3146_v49 = vld [vmem:[%s3683_s2 + $0x8] sm:$0xff]  }
  0x39   :  { %v152_v6 = vand.u32 %v2631_v4, %v147_v3  ;;  %v149_v7 = vand.u32 %v2633_v5, %v147_v3  ;;  %v3095_v11 = vshrl.u32 %v93_v10, 7  ;;  %v91_v13 = vld [vmem:[%s3685_s4] sm:$0x3]  ;;  %s2961_s4 = smov 32   ;;  %vm305_vm4 = vcmask 261120   ;;  %v3172_v60 = vld [vmem:[#allocation4 + $0x8] sm:$0xff]  }
  0x3a   :  { %v3137_v47 = vld [vmem:[%s3683_s2] sm:$0xff]   ;;  %s2964_s21 = smov 96   ;;  %vm311_vm5 = vcmask 523520   ;;  %vm1501_vm6 = vcmask 523264   ;;  %s2965_s15 = smov [#allocation10]  }
  0x3b   :  { %154 = vmatprep.subr.bf16.mxu0 %v152_v6  ;;  %2617 = vmatprep.subr.bf16.mxu1 %v152_v6  ;;  %v95_v12 = vsub.s32 0, %v3095_v11  ;;  %v99_v15 = vsub.s32 1, %v3095_v11  ;;  %v3168_v58 = vld [vmem:[#allocation4] sm:$0xff]   ;;  %s2279_s16 = sshll.u32 %s2965_s15, 4  ;;  %s2280_s16 = int_to_ptr.vmem [resolvable:$true] %s2279_s16 }
  0x3c   :  { %155 = vmatpush1.bf16.msra.mxu0 %v149_v7  ;;  %2618 = vmatpush1.bf16.msra.mxu1 %v149_v7  ;;  %p2931_p11 = scmp.lt.s32.totalorder %s2280_s16, %s2280_s16 }
  0x3d   :  { %v3103_v14 = vrot.slane %v91_v13, %v95_v12  ;;  %v3115_v21 = vrot.slane %v91_v13, %v99_v15  ;;  %2437 = vmatprep.subr.bf16.mxu1 %v2962_v48  ;;  %2469 = vmatprep.subr.bf16.mxu0 %v2962_v48 }
  0x3f   :  { %2295 = vmatmul.mubr.msk.bf16.vlgmr.msra.gmra.mrb[0].mxu0 %vm131_vm2, %v2634_v8  ;;  %2298 = vmatmul.mubr.msk.bf16.vlgmr.msra.gmra.mrb[0].mxu1 %vm131_vm2, %v2635_v9 }
  0x40   :  { %196 = vmatprep.mubr.bf16.mxu0 %v2959_v0  ;;  %2441 = vmatprep.mubr.msk.bf16.mxu1 %vm2963_vm3, %v2962_v48 }
  0x41   :  { %2438 = vmatpush3.bf16.msra.mxu1 %v3137_v47  ;;  %2470 = vmatpush3.bf16.msra.mxu0 %v3137_v47 }
  0x42   :  { %2439 = vmatprep.subr.bf16.mxu1 %v2962_v48  ;;  %2471 = vmatprep.subr.bf16.mxu0 %v2962_v48 }
  0x45   :  { %2440 = vmatpush3.bf16.msra.mxu1 %v3146_v49  ;;  %2472 = vmatpush3.bf16.msra.mxu0 %v3146_v49 }
  0x46   :  { %2445 = vmatprep.subr.bf16.mxu1 %v2962_v48  ;;  %2485 = vmatprep.subr.bf16.mxu0 %v2962_v48 }
 0x112   :  { %v188_v16 = vpop.f32.mrb[0].mxu0  ;;  %v3106_v17 = vpop.f32.mrb[0].mxu1 }
 0x113   :  { %v189_v18 = vadd.f32 %v188_v16, %v3103_v14  ;;  %v3109_v19 = vpop.f32.mrb[1].mxu0  ;;  %v3111_v20 = vpop.f32.mrb[1].mxu1 }
 0x114   :  { %v3117_v22 = vpop.f32.mrb[2].mxu0  ;;  %v3119_v23 = vpop.f32.mrb[2].mxu1  ;;  %v221_v5 = vadd.f32 %v3111_v20, %v3115_v21 }
 0x115   :  { %2660 = vtanh.f32 %v189_v18  ;;  %v3121_v24 = vpop.f32.mrb[3].mxu0  ;;  %v224_v25 = vpop.f32.mrb[3].mxu1  ;;  %v2299_v29 = vmul.f32 -1.442695, %v189_v18  ;;  %v193_v62 = vadd.f32 %v3117_v22, %v3103_v14 }
 0x116   :  { %v225_v26 = vadd.f32 %v224_v25, %v3115_v21 }
 0x118   :  { %2662 = vtanh.f32 %v225_v26  ;;  %v2300_v30 = vmul.f32 -1.442695, %v225_v26 }
 0x119   :  { %2664 = vpow2.f32 %v2299_v29 }
 0x11a   :  { %2666 = vpow2.f32 %v2300_v30 }
 0x11f   :  { %v2661_v27 = vpop.eup %2660 }
 0x120   :  { %262 = vrot.lane.b32.xlu0 %v2661_v27, %s2961_s4 }
 0x122   :  { %v2663_v28 = vpop.eup %2662 }
 0x123   :  { %v2665_v31 = vpop.eup %2664 }
 0x124   :  { %286 = vrot.lane.b32.xlu0 %v2663_v28, %s2961_s4  ;;  %v256_v32 = vadd.f32 1.0, %v2665_v31  ;;  %v2667_v33 = vpop.eup %2666 }
 0x125   :  { %v280_v34 = vadd.f32 1.0, %v2667_v33 }
 0x126   :  { %2668 = vrcp.f32 %v256_v32 }
 0x127   :  { %2670 = vrcp.f32 %v280_v34 }
 0x130   :  { %v2669_v35 = vpop.eup %2668 }
 0x131   :  { %v2671_v38 = vpop.eup %2670  ;;  %v260_v41 = vmul.f32 0.0, %v2669_v35 }
 0x132   :  { %v284_v44 = vmul.f32 0.0, %v2671_v38 }
 0x192   :  { %v263_v36 = vpop.permute.xlu0 %262 }
 0x193   :  { %v265_v37 = vmul.f32 %v2669_v35, %v263_v36 }
 0x195   :  { %267 = vrot.lane.b32.xlu1 %v265_v37, %s2961_s4 }
 0x196   :  { %v287_v39 = vpop.permute.xlu0 %286 }
 0x197   :  { %v289_v40 = vmul.f32 %v2671_v38, %v287_v39 }
 0x199   :  { %291 = vrot.lane.b32.xlu1 %v289_v40, %s2961_s4 }
 0x207   :  { %v268_v42 = vpop.permute.xlu1 %267 }
 0x208   :  { %v3128_v43 = vadd.f32 %v268_v42, %v260_v41  ;;  %v2640_v41 = vld [vmem:[%s3681_s0 + $0x8] sm:$0xff]  }
 0x209   :  { %2296 = vmatmul.mubr.msk.bf16.gmra.mrb[4].mxu0 %vm131_vm2, %v2640_v41 }
 0x20a   :  { %2672 = vtanh.f32 %v3128_v43  ;;  %206 = vmatprep.mubr.bf16.mxu0 %v2959_v0 }
 0x20b   :  { %v292_v45 = vpop.permute.xlu1 %291 }
 0x20c   :  { %v3131_v46 = vadd.f32 %v292_v45, %v284_v44 }
 0x20e   :  { %2674 = vtanh.f32 %v3131_v46 }
 0x214   :  { %v2673_v50 = vpop.eup %2672 }
 0x215   :  { %273 = vrot.lane.b32.xlu0 %v2673_v50, %s2961_s4 }
 0x218   :  { %v2675_v51 = vpop.eup %2674 }
 0x219   :  { %297 = vrot.lane.b32.xlu1 %v2675_v51, %s2961_s4 }
 0x287   :  { %v274_v52 = vpop.permute.xlu0 %273 }
 0x288   :  { %v3158_v53 = vmul.f32 %v2669_v35, %v274_v52 }
 0x28a   :  { %v315_v54 = vpack.c.bf16 %v3158_v53, %v3158_v53 }
 0x28b   :  { %v298_v55 = vpop.permute.xlu1 %297 }
 0x28c   :  { %v3162_v56 = vmul.f32 %v2671_v38, %v298_v55  ;;  %317 = vrot.lane.b32.xlu0 %v315_v54, %s2956_s29 }
 0x28e   :  { %v375_v57 = vpack.c.bf16 %v3162_v56, %v3162_v56 }
 0x290   :  { %377 = vrot.lane.b32.xlu1 %v375_v57, %s2956_s29 }
 0x2dc   :  { %v198_v54 = vpop.f32.mrb[4].mxu0 }
 0x2dd   :  { %v3225_v55 = vpop.f32.mrb[5].mxu0 }
 0x2de   :  { %v3227_v57 = vpop.f32.mrb[6].mxu0 }
 0x2fe   :  { %v318_v59 = vpop.permute.xlu0 %317 }
 0x2ff   :  { %2442 = vmatmul.mubr.msk.bf16.vlgmr.msra.gmra.mrb[4].mxu1 %vm305_vm4, %v318_v59  ;;  %v3229_v59 = vpop.f32.mrb[7].mxu0 }
 0x300   :  { %2446 = vmatpush3.bf16.msra.mxu1 %v3168_v58  ;;  %2449 = vmatprep.mubr.msk.bf16.mxu1 %vm2963_vm3, %v2962_v48 }
 0x301   :  { %2447 = vmatprep.subr.bf16.mxu1 %v2962_v48 }
 0x302   :  { %v378_v61 = vpop.permute.xlu1 %377 }
 0x304   :  { %2448 = vmatpush3.bf16.msra.mxu1 %v3172_v60 }
 0x305   :  { %2453 = vmatprep.subr.bf16.mxu1 %v2962_v48 }
 0x307   :  { %2450 = vmatmul.mubr.msk.bf16.vlgmr.msra.gmra.mrb[8].mxu1 %vm305_vm4, %v378_v61 }
 0x308   :  { %2454 = vmatpush3.bf16.msra.mxu1 %v3137_v47  ;;  %2457 = vmatprep.mubr.msk.bf16.mxu1 %vm2963_vm3, %v2962_v48 }
 0x309   :  { %2455 = vmatprep.subr.bf16.mxu1 %v2962_v48 }
 0x30c   :  { %2456 = vmatpush3.bf16.msra.mxu1 %v3146_v49 }
 0x30d   :  { %2461 = vmatprep.subr.bf16.mxu1 %v2962_v48 }
 0x3d2   :  { %v368_v63 = vpop.f32.mrb[4].mxu1 }
 0x3d3   :  { %v374_v1 = vadd.f32 %v368_v63, %v193_v62  ;;  %v2443_v2 = vpop.f32.mrb[5].mxu1 }
 0x3d4   :  { %v371_v3 = vpop.f32.mrb[6].mxu1 }
 0x3d5   :  { %2676 = vtanh.f32 %v374_v1  ;;  %v2444_v4 = vpop.f32.mrb[7].mxu1  ;;  %v2307_v18 = vmul.f32 -1.442695, %v374_v1 }
 0x3d6   :  { %v199_v4 = vadd.f32 %v198_v54, %v3103_v14 }
 0x3da   :  { %v428_v6 = vpop.f32.mrb[8].mxu1 }
 0x3db   :  { %v434_v7 = vadd.f32 %v428_v6, %v221_v5  ;;  %v2451_v8 = vpop.f32.mrb[9].mxu1 }
 0x3dc   :  { %v431_v9 = vpop.f32.mrb[10].mxu1 }
 0x3dd   :  { %2678 = vtanh.f32 %v434_v7  ;;  %v2452_v10 = vpop.f32.mrb[11].mxu1  ;;  %v2308_v22 = vmul.f32 -1.442695, %v434_v7 }
 0x3de   :  { %2680 = vpow2.f32 %v2307_v18 }
 0x3df   :  { %v2677_v13 = vpop.eup %2676  ;;  %2682 = vpow2.f32 %v2308_v22 }
 0x3e0   :  { %444 = vrot.lane.b32.xlu0 %v2677_v13, %s2961_s4 }
 0x3e7   :  { %v2679_v16 = vpop.eup %2678 }
 0x3e8   :  { %468 = vrot.lane.b32.xlu1 %v2679_v16, %s2961_s4  ;;  %v2681_v25 = vpop.eup %2680 }
 0x3e9   :  { %v438_v26 = vadd.f32 1.0, %v2681_v25  ;;  %v2683_v20 = vpop.eup %2682 }
 0x3ea   :  { %v462_v27 = vadd.f32 1.0, %v2683_v20 }
 0x3eb   :  { %2684 = vrcp.f32 %v438_v26 }
 0x3ec   :  { %2686 = vrcp.f32 %v462_v27 }
 0x3f5   :  { %v2685_v28 = vpop.eup %2684 }
 0x3f6   :  { %v2687_v31 = vpop.eup %2686  ;;  %v442_v34 = vmul.f32 %v2685_v28, %v3128_v43  ;;  %v2641_v43 = vld [vmem:[%s3681_s0 + $0x10] sm:$0xff]  }
 0x3f7   :  { %v466_v37 = vmul.f32 %v2687_v31, %v3131_v46  ;;  %2297 = vmatmul.mubr.msk.bf16.gmra.mrb[8].mxu0 %vm131_vm2, %v2641_v43 }
 0x3f8   :  { %2473 = vmatprep.mubr.msk.bf16.mxu0 %vm2963_vm3, %v2962_v48 }
 0x452   :  { %v445_v29 = vpop.permute.xlu0 %444 }
 0x453   :  { %v447_v30 = vmul.f32 %v2685_v28, %v445_v29 }
 0x455   :  { %449 = vrot.lane.b32.xlu0 %v447_v30, %s2961_s4 }
 0x45a   :  { %v469_v32 = vpop.permute.xlu1 %468 }
 0x45b   :  { %v471_v33 = vmul.f32 %v2687_v31, %v469_v32 }
 0x45d   :  { %473 = vrot.lane.b32.xlu1 %v471_v33, %s2961_s4 }
 0x4c7   :  { %v450_v35 = vpop.permute.xlu0 %449 }
 0x4c8   :  { %v3195_v36 = vadd.f32 %v450_v35, %v442_v34 }
 0x4ca   :  { %2688 = vtanh.f32 %v3195_v36  ;;  %v3245_v63 = vpop.f32.mrb[8].mxu0 }
 0x4cb   :  { %v3247_v1 = vpop.f32.mrb[9].mxu0 }
 0x4cc   :  { %v3249_v2 = vpop.f32.mrb[10].mxu0 }
 0x4cd   :  { %v214_v3 = vpop.f32.mrb[11].mxu0 }
 0x4ce   :  { %v215_v10 = vadd.f32 %v214_v3, %v3115_v21 }
 0x4cf   :  { %v474_v38 = vpop.permute.xlu1 %473 }
 0x4d0   :  { %v3199_v39 = vadd.f32 %v474_v38, %v466_v37 }
 0x4d2   :  { %2690 = vtanh.f32 %v3199_v39 }
 0x4d4   :  { %v2689_v40 = vpop.eup %2688 }
 0x4d5   :  { %455 = vrot.lane.b32.xlu0 %v2689_v40, %s2961_s4 }
 0x4dc   :  { %v2691_v42 = vpop.eup %2690 }
 0x4dd   :  { %479 = vrot.lane.b32.xlu1 %v2691_v42, %s2961_s4 }
 0x547   :  { %v456_v44 = vpop.permute.xlu0 %455 }
 0x548   :  { %v3215_v45 = vmul.f32 %v2685_v28, %v456_v44 }
 0x54a   :  { %v495_v46 = vpack.c.bf16 %v3215_v45, %v3215_v45 }
 0x54c   :  { %497 = vrot.lane.b32.xlu0 %v495_v46, %s2956_s29 }
 0x54f   :  { %v480_v50 = vpop.permute.xlu1 %479 }
 0x550   :  { %v3220_v51 = vmul.f32 %v2687_v31, %v480_v50 }
 0x552   :  { %v543_v52 = vpack.c.bf16 %v3220_v51, %v3220_v51 }
 0x554   :  { %545 = vrot.lane.b32.xlu1 %v543_v52, %s2956_s29 }
 0x5be   :  { %v498_v61 = vpop.permute.xlu0 %497 }
 0x5bf   :  { %2458 = vmatmul.mubr.msk.bf16.vlgmr.msra.gmra.mrb[12].mxu1 %vm305_vm4, %v498_v61 }
 0x5c0   :  { %2462 = vmatpush3.bf16.msra.mxu1 %v3168_v58  ;;  %2465 = vmatprep.mubr.msk.bf16.mxu1 %vm2963_vm3, %v2962_v48 }
 0x5c1   :  { %2463 = vmatprep.subr.bf16.mxu1 %v2962_v48 }
 0x5c4   :  { %2464 = vmatpush3.bf16.msra.mxu1 %v3172_v60 }
 0x5c5   :  { %2477 = vmatprep.subr.bf16.mxu1 %v2962_v48 }
 0x5c6   :  { %v546_v62 = vpop.permute.xlu1 %545 }
 0x5c7   :  { %2466 = vmatmul.mubr.msk.bf16.vlgmr.msra.gmra.mrb[16].mxu1 %vm305_vm4, %v546_v62 }
 0x5c8   :  { %2478 = vmatpush3.bf16.msra.mxu1 %v3168_v58  ;;  %2481 = vmatprep.mubr.msk.bf16.mxu1 %vm2963_vm3, %v2962_v48 }
 0x5c9   :  { %2479 = vmatprep.subr.bf16.mxu1 %v2962_v48 }
 0x5cc   :  { %2480 = vmatpush3.bf16.msra.mxu1 %v3172_v60 }
 0x5cd   :  { %2493 = vmatprep.subr.bf16.mxu1 %v2962_v48 }
 0x692   :  { %v536_v5 = vpop.f32.mrb[12].mxu1 }
 0x693   :  { %v542_v6 = vadd.f32 %v536_v5, %v199_v4  ;;  %v2459_v7 = vpop.f32.mrb[13].mxu1 }
 0x694   :  { %v539_v8 = vpop.f32.mrb[14].mxu1 }
 0x695   :  { %v2460_v9 = vpop.f32.mrb[15].mxu1  ;;  %v2311_v38 = vmul.f32 -1.442695, %v542_v6 }
 0x69a   :  { %v584_v13 = vpop.f32.mrb[16].mxu1 }
 0x69b   :  { %v590_v16 = vadd.f32 %v584_v13, %v215_v10  ;;  %v2467_v18 = vpop.f32.mrb[17].mxu1 }
 0x69c   :  { %v587_v22 = vpop.f32.mrb[18].mxu1 }
 0x69d   :  { %2692 = vtanh.f32 %v590_v16  ;;  %v2468_v25 = vpop.f32.mrb[19].mxu1  ;;  %v2312_v20 = vmul.f32 -1.442695, %v590_v16 }
 0x69f   :  { %2694 = vpow2.f32 %v2312_v20 }
 0x6a7   :  { %v2693_v26 = vpop.eup %2692 }
 0x6a8   :  { %624 = vrot.lane.b32.xlu0 %v2693_v26, %s2961_s4 }
 0x6a9   :  { %v2695_v27 = vpop.eup %2694 }
 0x6aa   :  { %v618_v28 = vadd.f32 1.0, %v2695_v27 }
 0x6ac   :  { %2696 = vrcp.f32 %v618_v28 }
 0x6b6   :  { %v2697_v29 = vpop.eup %2696 }
 0x6b7   :  { %v622_v32 = vmul.f32 %v2697_v29, %v3199_v39 }
 0x71a   :  { %v625_v30 = vpop.permute.xlu0 %624 }
 0x71b   :  { %v627_v31 = vmul.f32 %v2697_v29, %v625_v30 }
 0x71d   :  { %629 = vrot.lane.b32.xlu1 %v627_v31, %s2961_s4  ;;  %v203_v31 = vadd.f32 %v3227_v57, %v3103_v14 }
 0x78f   :  { %v630_v33 = vpop.permute.xlu1 %629 }
 0x790   :  { %v632_v34 = vadd.f32 %v630_v33, %v622_v32 }
 0x792   :  { %2698 = vtanh.f32 %v632_v34 }
 0x793   :  { %2700 = vtanh.f32 %v542_v6  ;;  %v211_v6 = vadd.f32 %v3247_v1, %v3115_v21 }
 0x794   :  { %2702 = vpow2.f32 %v2311_v38 }
 0x79c   :  { %v2699_v35 = vpop.eup %2698 }
 0x79d   :  { %635 = vrot.lane.b32.xlu0 %v2699_v35, %s2961_s4  ;;  %v2701_v37 = vpop.eup %2700 }
 0x79e   :  { %v2703_v40 = vpop.eup %2702 }
 0x79f   :  { %v594_v41 = vadd.f32 1.0, %v2703_v40 }
 0x7a1   :  { %600 = vrot.lane.b32.xlu0 %v2701_v37, %s2961_s4  ;;  %2704 = vrcp.f32 %v594_v41 }
 0x7ab   :  { %v2705_v44 = vpop.eup %2704 }
 0x7ac   :  { %v598_v54 = vmul.f32 %v2705_v44, %v3195_v36 }
 0x80f   :  { %v636_v42 = vpop.permute.xlu0 %635 }
 0x810   :  { %v3258_v43 = vmul.f32 %v2697_v29, %v636_v42 }
 0x812   :  { %v699_v39 = vpack.c.bf16 %v3258_v43, %v3258_v43 }
 0x813   :  { %v601_v46 = vpop.permute.xlu0 %600 }
 0x814   :  { %v603_v50 = vmul.f32 %v2705_v44, %v601_v46  ;;  %701 = vrot.lane.b32.xlu1 %v699_v39, %s2956_s29 }
 0x816   :  { %605 = vrot.lane.b32.xlu0 %v603_v50, %s2961_s4 }
 0x886   :  { %v702_v52 = vpop.permute.xlu1 %701 }
 0x887   :  { %2482 = vmatmul.mubr.msk.bf16.vlgmr.msra.gmra.mrb[20].mxu1 %vm305_vm4, %v702_v52 }
 0x888   :  { %v606_v61 = vpop.permute.xlu0 %605  ;;  %2494 = vmatpush3.bf16.msra.mxu1 %v3168_v58  ;;  %2497 = vmatprep.mubr.msk.bf16.mxu1 %vm2963_vm3, %v2962_v48 }
 0x889   :  { %v3269_v62 = vadd.f32 %v606_v61, %v598_v54  ;;  %2495 = vmatprep.subr.bf16.mxu1 %v2962_v48 }
 0x88b   :  { %2706 = vtanh.f32 %v3269_v62 }
 0x88c   :  { %2496 = vmatpush3.bf16.msra.mxu1 %v3172_v60 }
 0x88d   :  { %2509 = vmatprep.subr.bf16.mxu1 %v2962_v48 }
 0x895   :  { %v2707_v3 = vpop.eup %2706 }
 0x896   :  { %611 = vrot.lane.b32.xlu0 %v2707_v3, %s2961_s4 }
 0x908   :  { %v612_v36 = vpop.permute.xlu0 %611 }
 0x909   :  { %v3276_v4 = vmul.f32 %v2705_v44, %v612_v36 }
 0x90b   :  { %v651_v5 = vpack.c.bf16 %v3276_v4, %v3276_v4 }
 0x90d   :  { %653 = vrot.lane.b32.xlu0 %v651_v5, %s2956_s29 }
 0x95a   :  { %v740_v7 = vpop.f32.mrb[20].mxu1 }
 0x95b   :  { %v746_v8 = vadd.f32 %v740_v7, %v211_v6  ;;  %v2483_v9 = vpop.f32.mrb[21].mxu1 }
 0x95c   :  { %v743_v10 = vpop.f32.mrb[22].mxu1  ;;  %v205_v9 = vadd.f32 %v3229_v59, %v3115_v21 }
 0x95d   :  { %2708 = vtanh.f32 %v746_v8  ;;  %v2484_v13 = vpop.f32.mrb[23].mxu1  ;;  %v2316_v1 = vmul.f32 -1.442695, %v746_v8 }
 0x95f   :  { %2710 = vpow2.f32 %v2316_v1 }
 0x967   :  { %v2709_v16 = vpop.eup %2708 }
 0x968   :  { %780 = vrot.lane.b32.xlu1 %v2709_v16, %s2961_s4 }
 0x969   :  { %v2711_v22 = vpop.eup %2710 }
 0x96a   :  { %v774_v25 = vadd.f32 1.0, %v2711_v22 }
 0x96c   :  { %2712 = vrcp.f32 %v774_v25 }
 0x976   :  { %v2713_v26 = vpop.eup %2712 }
 0x977   :  { %v778_v28 = vmul.f32 %v2713_v26, %v632_v34 }
 0x97f   :  { %v654_v18 = vpop.permute.xlu0 %653 }
 0x980   :  { %2474 = vmatmul.mubr.msk.bf16.vlgmr.msra.gmra.mrb[12].mxu0 %vm305_vm4, %v654_v18 }
 0x981   :  { %2486 = vmatpush3.bf16.msra.mxu0 %v3137_v47  ;;  %2489 = vmatprep.mubr.msk.bf16.mxu0 %vm2963_vm3, %v2962_v48 }
 0x982   :  { %2487 = vmatprep.subr.bf16.mxu0 %v2962_v48 }
 0x985   :  { %2488 = vmatpush3.bf16.msra.mxu0 %v3146_v49 }
 0x986   :  { %2501 = vmatprep.subr.bf16.mxu0 %v2962_v48 }
 0x9da   :  { %v781_v20 = vpop.permute.xlu1 %780 }
 0x9db   :  { %v783_v27 = vmul.f32 %v2713_v26, %v781_v20 }
 0x9dd   :  { %785 = vrot.lane.b32.xlu1 %v783_v27, %s2961_s4 }
 0xa4f   :  { %v786_v29 = vpop.permute.xlu1 %785 }
 0xa50   :  { %v3292_v30 = vadd.f32 %v786_v29, %v778_v28 }
 0xa52   :  { %2714 = vtanh.f32 %v3292_v30 }
 0xa53   :  { %v692_v32 = vpop.f32.mrb[12].mxu0 }
 0xa54   :  { %v698_v33 = vadd.f32 %v692_v32, %v203_v31  ;;  %v2475_v35 = vpop.f32.mrb[13].mxu0 }
 0xa55   :  { %v695_v37 = vpop.f32.mrb[14].mxu0  ;;  %v209_v35 = vadd.f32 %v3245_v63, %v3103_v14 }
 0xa56   :  { %2716 = vtanh.f32 %v698_v33  ;;  %v2476_v38 = vpop.f32.mrb[15].mxu0  ;;  %v2315_v34 = vmul.f32 -1.442695, %v698_v33 }
 0xa58   :  { %2718 = vpow2.f32 %v2315_v34 }
 0xa5c   :  { %v2715_v40 = vpop.eup %2714 }
 0xa5d   :  { %791 = vrot.lane.b32.xlu1 %v2715_v40, %s2961_s4 }
 0xa60   :  { %v2717_v41 = vpop.eup %2716 }
 0xa61   :  { %756 = vrot.lane.b32.xlu0 %v2717_v41, %s2961_s4 }
 0xa62   :  { %v2719_v42 = vpop.eup %2718 }
 0xa63   :  { %v750_v39 = vadd.f32 1.0, %v2719_v42 }
 0xa65   :  { %2720 = vrcp.f32 %v750_v39 }
 0xa6f   :  { %v2721_v50 = vpop.eup %2720 }
 0xa70   :  { %v754_v3 = vmul.f32 %v2721_v50, %v3269_v62 }
 0xacf   :  { %v792_v57 = vpop.permute.xlu1 %791 }
 0xad0   :  { %v3299_v44 = vmul.f32 %v2713_v26, %v792_v57 }
 0xad2   :  { %v855_v46 = vpack.c.bf16 %v3299_v44, %v3299_v44 }
 0xad3   :  { %v757_v52 = vpop.permute.xlu0 %756 }
 0xad4   :  { %v759_v54 = vmul.f32 %v2721_v50, %v757_v52  ;;  %857 = vrot.lane.b32.xlu1 %v855_v46, %s2956_s29 }
 0xad6   :  { %761 = vrot.lane.b32.xlu0 %v759_v54, %s2961_s4 }
 0xb46   :  { %v858_v61 = vpop.permute.xlu1 %857 }
 0xb47   :  { %2498 = vmatmul.mubr.msk.bf16.vlgmr.msra.gmra.mrb[24].mxu1 %vm305_vm4, %v858_v61 }
 0xb48   :  { %v762_v36 = vpop.permute.xlu0 %761  ;;  %2510 = vmatpush3.bf16.msra.mxu1 %v3168_v58  ;;  %2513 = vmatprep.mubr.msk.bf16.mxu1 %vm2963_vm3, %v2962_v48 }
 0xb49   :  { %v3310_v5 = vadd.f32 %v762_v36, %v754_v3  ;;  %2511 = vmatprep.subr.bf16.mxu1 %v2962_v48 }
 0xb4b   :  { %2722 = vtanh.f32 %v3310_v5 }
 0xb4c   :  { %2512 = vmatpush3.bf16.msra.mxu1 %v3172_v60 }
 0xb4d   :  { %2525 = vmatprep.subr.bf16.mxu1 %v2962_v48 }
 0xb55   :  { %v2723_v6 = vpop.eup %2722 }
 0xb56   :  { %767 = vrot.lane.b32.xlu0 %v2723_v6, %s2961_s4 }
 0xbc8   :  { %v768_v62 = vpop.permute.xlu0 %767 }
 0xbc9   :  { %v3317_v7 = vmul.f32 %v2721_v50, %v768_v62 }
 0xbcb   :  { %v807_v8 = vpack.c.bf16 %v3317_v7, %v3317_v7 }
 0xbcd   :  { %809 = vrot.lane.b32.xlu0 %v807_v8, %s2956_s29 }
 0xc1a   :  { %v896_v10 = vpop.f32.mrb[24].mxu1 }
 0xc1b   :  { %v902_v13 = vadd.f32 %v896_v10, %v205_v9  ;;  %v2499_v16 = vpop.f32.mrb[25].mxu1 }
 0xc1c   :  { %v899_v18 = vpop.f32.mrb[26].mxu1  ;;  %v201_v16 = vadd.f32 %v3225_v55, %v3115_v21 }
 0xc1d   :  { %2724 = vtanh.f32 %v902_v13  ;;  %v2500_v1 = vpop.f32.mrb[27].mxu1  ;;  %v2320_v59 = vmul.f32 -1.442695, %v902_v13 }
 0xc1f   :  { %2726 = vpow2.f32 %v2320_v59 }
 0xc27   :  { %v2725_v22 = vpop.eup %2724 }
 0xc28   :  { %936 = vrot.lane.b32.xlu1 %v2725_v22, %s2961_s4 }
 0xc29   :  { %v2727_v26 = vpop.eup %2726 }
 0xc2a   :  { %v930_v20 = vadd.f32 1.0, %v2727_v26 }
 0xc2c   :  { %2728 = vrcp.f32 %v930_v20 }
 0xc36   :  { %v2729_v27 = vpop.eup %2728 }
 0xc37   :  { %v934_v31 = vmul.f32 %v2729_v27, %v3292_v30 }
 0xc3f   :  { %v810_v25 = vpop.permute.xlu0 %809 }
 0xc40   :  { %2490 = vmatmul.mubr.msk.bf16.vlgmr.msra.gmra.mrb[16].mxu0 %vm305_vm4, %v810_v25 }
 0xc41   :  { %2502 = vmatpush3.bf16.msra.mxu0 %v3137_v47  ;;  %2505 = vmatprep.mubr.msk.bf16.mxu0 %vm2963_vm3, %v2962_v48 }
 0xc42   :  { %2503 = vmatprep.subr.bf16.mxu0 %v2962_v48 }
 0xc45   :  { %2504 = vmatpush3.bf16.msra.mxu0 %v3146_v49 }
 0xc46   :  { %2517 = vmatprep.subr.bf16.mxu0 %v2962_v48 }
 0xc9a   :  { %v937_v28 = vpop.permute.xlu1 %936 }
 0xc9b   :  { %v939_v29 = vmul.f32 %v2729_v27, %v937_v28 }
 0xc9d   :  { %941 = vrot.lane.b32.xlu1 %v939_v29, %s2961_s4 }
 0xd0f   :  { %v942_v32 = vpop.permute.xlu1 %941 }
 0xd10   :  { %v3334_v33 = vadd.f32 %v942_v32, %v934_v31 }
 0xd12   :  { %2730 = vtanh.f32 %v3334_v33 }
 0xd13   :  { %v848_v37 = vpop.f32.mrb[16].mxu0 }
 0xd14   :  { %v854_v38 = vadd.f32 %v848_v37, %v209_v35  ;;  %v2491_v40 = vpop.f32.mrb[17].mxu0 }
 0xd15   :  { %v851_v41 = vpop.f32.mrb[18].mxu0  ;;  %v213_v40 = vadd.f32 %v3249_v2, %v3103_v14 }
 0xd16   :  { %2732 = vtanh.f32 %v854_v38  ;;  %v2492_v34 = vpop.f32.mrb[19].mxu0  ;;  %v2319_v30 = vmul.f32 -1.442695, %v854_v38 }
 0xd18   :  { %2734 = vpow2.f32 %v2319_v30 }
 0xd1c   :  { %v2731_v42 = vpop.eup %2730 }
 0xd1d   :  { %947 = vrot.lane.b32.xlu1 %v2731_v42, %s2961_s4 }
 0xd20   :  { %v2733_v39 = vpop.eup %2732 }
 0xd21   :  { %912 = vrot.lane.b32.xlu0 %v2733_v39, %s2961_s4 }
 0xd22   :  { %v2735_v57 = vpop.eup %2734 }
 0xd23   :  { %v906_v46 = vadd.f32 1.0, %v2735_v57 }
 0xd25   :  { %2736 = vrcp.f32 %v906_v46 }
 0xd2f   :  { %v2737_v54 = vpop.eup %2736 }
 0xd30   :  { %v910_v6 = vmul.f32 %v2737_v54, %v3310_v5 }
 0xd8f   :  { %v948_v63 = vpop.permute.xlu1 %947 }
 0xd90   :  { %v3341_v50 = vmul.f32 %v2729_v27, %v948_v63 }
 0xd92   :  { %v1011_v52 = vpack.c.bf16 %v3341_v50, %v3341_v50 }
 0xd93   :  { %v913_v61 = vpop.permute.xlu0 %912 }
 0xd94   :  { %v915_v3 = vmul.f32 %v2737_v54, %v913_v61  ;;  %1013 = vrot.lane.b32.xlu1 %v1011_v52, %s2956_s29 }
 0xd96   :  { %917 = vrot.lane.b32.xlu0 %v915_v3, %s2961_s4 }
 0xe06   :  { %v1014_v36 = vpop.permute.xlu1 %1013 }
 0xe07   :  { %2514 = vmatmul.mubr.msk.bf16.vlgmr.msra.gmra.mrb[28].mxu1 %vm305_vm4, %v1014_v36 }
 0xe08   :  { %v918_v62 = vpop.permute.xlu0 %917  ;;  %2526 = vmatpush3.bf16.msra.mxu1 %v3168_v58  ;;  %2529 = vmatprep.mubr.msk.bf16.mxu1 %vm2963_vm3, %v2962_v48 }
 0xe09   :  { %v3352_v8 = vadd.f32 %v918_v62, %v910_v6  ;;  %2527 = vmatprep.subr.bf16.mxu1 %v2962_v48 }
 0xe0b   :  { %2738 = vtanh.f32 %v3352_v8 }
 0xe0c   :  { %2528 = vmatpush3.bf16.msra.mxu1 %v3172_v60 }
 0xe0d   :  { %2541 = vmatprep.subr.bf16.mxu1 %v2962_v48 }
 0xe15   :  { %v2739_v9 = vpop.eup %2738 }
 0xe16   :  { %923 = vrot.lane.b32.xlu0 %v2739_v9, %s2961_s4 }
 0xe88   :  { %v924_v5 = vpop.permute.xlu0 %923 }
 0xe89   :  { %v3359_v10 = vmul.f32 %v2737_v54, %v924_v5 }
 0xe8b   :  { %v963_v13 = vpack.c.bf16 %v3359_v10, %v3359_v10 }
 0xe8d   :  { %965 = vrot.lane.b32.xlu0 %v963_v13, %s2956_s29 }
 0xeda   :  { %v1052_v18 = vpop.f32.mrb[28].mxu1 }
 0xedb   :  { %v1058_v1 = vadd.f32 %v1052_v18, %v201_v16  ;;  %v2515_v22 = vpop.f32.mrb[29].mxu1 }
 0xedc   :  { %v1055_v25 = vpop.f32.mrb[30].mxu1 }
 0xedd   :  { %2740 = vtanh.f32 %v1058_v1  ;;  %v2516_v59 = vpop.f32.mrb[31].mxu1  ;;  %v2324_v55 = vmul.f32 -1.442695, %v1058_v1  ;;  %v195_v1 = vadd.f32 %v3121_v24, %v3115_v21 }
 0xedf   :  { %2742 = vpow2.f32 %v2324_v55 }
 0xee7   :  { %v2741_v26 = vpop.eup %2740 }
 0xee8   :  { %1092 = vrot.lane.b32.xlu1 %v2741_v26, %s2961_s4 }
 0xee9   :  { %v2743_v27 = vpop.eup %2742 }
 0xeea   :  { %v1086_v28 = vadd.f32 1.0, %v2743_v27 }
 0xeec   :  { %2744 = vrcp.f32 %v1086_v28 }
 0xef6   :  { %v2745_v29 = vpop.eup %2744 }
 0xef7   :  { %v1090_v35 = vmul.f32 %v2745_v29, %v3334_v33 }
 0xeff   :  { %v966_v20 = vpop.permute.xlu0 %965 }
 0xf00   :  { %2506 = vmatmul.mubr.msk.bf16.vlgmr.msra.gmra.mrb[20].mxu0 %vm305_vm4, %v966_v20 }
 0xf01   :  { %2518 = vmatpush3.bf16.msra.mxu0 %v3137_v47  ;;  %2521 = vmatprep.mubr.msk.bf16.mxu0 %vm2963_vm3, %v2962_v48 }
 0xf02   :  { %2519 = vmatprep.subr.bf16.mxu0 %v2962_v48 }
 0xf05   :  { %2520 = vmatpush3.bf16.msra.mxu0 %v3146_v49 }
 0xf06   :  { %2533 = vmatprep.subr.bf16.mxu0 %v2962_v48 }
 0xf5a   :  { %v1093_v31 = vpop.permute.xlu1 %1092 }
 0xf5b   :  { %v1095_v32 = vmul.f32 %v2745_v29, %v1093_v31 }
 0xf5d   :  { %1097 = vrot.lane.b32.xlu1 %v1095_v32, %s2961_s4 }
 0xfcf   :  { %v1098_v37 = vpop.permute.xlu1 %1097 }
 0xfd0   :  { %v3376_v38 = vadd.f32 %v1098_v37, %v1090_v35 }
 0xfd2   :  { %2746 = vtanh.f32 %v3376_v38 }
 0xfd3   :  { %v1004_v41 = vpop.f32.mrb[20].mxu0 }
 0xfd4   :  { %v1010_v34 = vadd.f32 %v1004_v41, %v213_v40  ;;  %v2507_v42 = vpop.f32.mrb[21].mxu0  ;;  %v219_v40 = vadd.f32 %v3106_v17, %v3103_v14 }
 0xfd5   :  { %v1007_v39 = vpop.f32.mrb[22].mxu0 }
 0xfd6   :  { %2748 = vtanh.f32 %v1010_v34  ;;  %v2508_v30 = vpop.f32.mrb[23].mxu0  ;;  %v2323_v33 = vmul.f32 -1.442695, %v1010_v34 }
 0xfd8   :  { %2750 = vpow2.f32 %v2323_v33 }
 0xfdc   :  { %v2747_v57 = vpop.eup %2746 }
 0xfdd   :  { %1103 = vrot.lane.b32.xlu1 %v2747_v57, %s2961_s4 }
 0xfe0   :  { %v2749_v46 = vpop.eup %2748 }
 0xfe1   :  { %1068 = vrot.lane.b32.xlu0 %v2749_v46, %s2961_s4 }
 0xfe2   :  { %v2751_v63 = vpop.eup %2750 }
 0xfe3   :  { %v1062_v52 = vadd.f32 1.0, %v2751_v63 }
 0xfe5   :  { %2752 = vrcp.f32 %v1062_v52 }
 0xfef   :  { %v2753_v3 = vpop.eup %2752 }
 0xff0   :  { %v1066_v9 = vmul.f32 %v2753_v3, %v3352_v8 }
0x104f   :  { %v1104_v2 = vpop.permute.xlu1 %1103 }
0x1050   :  { %v3383_v54 = vmul.f32 %v2745_v29, %v1104_v2 }
0x1052   :  { %v1167_v61 = vpack.c.bf16 %v3383_v54, %v3383_v54 }
0x1053   :  { %v1069_v36 = vpop.permute.xlu0 %1068 }
0x1054   :  { %v1071_v6 = vmul.f32 %v2753_v3, %v1069_v36  ;;  %1169 = vrot.lane.b32.xlu1 %v1167_v61, %s2956_s29 }
0x1056   :  { %1073 = vrot.lane.b32.xlu0 %v1071_v6, %s2961_s4 }
0x10c6   :  { %v1170_v62 = vpop.permute.xlu1 %1169 }
0x10c7   :  { %2530 = vmatmul.mubr.msk.bf16.vlgmr.msra.gmra.mrb[32].mxu1 %vm305_vm4, %v1170_v62 }
0x10c8   :  { %v1074_v5 = vpop.permute.xlu0 %1073  ;;  %2542 = vmatpush3.bf16.msra.mxu1 %v3168_v58  ;;  %2545 = vmatprep.mubr.msk.bf16.mxu1 %vm2963_vm3, %v2962_v48 }
0x10c9   :  { %v3394_v13 = vadd.f32 %v1074_v5, %v1066_v9  ;;  %2543 = vmatprep.subr.bf16.mxu1 %v2962_v48 }
0x10cb   :  { %2754 = vtanh.f32 %v3394_v13 }
0x10cc   :  { %2544 = vmatpush3.bf16.msra.mxu1 %v3172_v60 }
0x10cd   :  { %2549 = vmatprep.subr.bf16.mxu1 %v2962_v48 }
0x10d5   :  { %v2755_v16 = vpop.eup %2754 }
0x10d6   :  { %1079 = vrot.lane.b32.xlu0 %v2755_v16, %s2961_s4 }
0x1148   :  { %v1080_v8 = vpop.permute.xlu0 %1079 }
0x1149   :  { %v3401_v18 = vmul.f32 %v2753_v3, %v1080_v8 }
0x114b   :  { %v1119_v58 = vpack.c.bf16 %v3401_v18, %v3401_v18 }
0x114d   :  { %1121 = vrot.lane.b32.xlu0 %v1119_v58, %s2956_s29 }
0x119a   :  { %v1208_v22 = vpop.f32.mrb[32].mxu1 }
0x119b   :  { %v1214_v25 = vadd.f32 %v1208_v22, %v195_v1  ;;  %v2531_v59 = vpop.f32.mrb[33].mxu1 }
0x119c   :  { %v1211_v60 = vpop.f32.mrb[34].mxu1 }
0x119d   :  { %2756 = vtanh.f32 %v1214_v25  ;;  %v2532_v26 = vpop.f32.mrb[35].mxu1  ;;  %v2328_v24 = vmul.f32 -1.442695, %v1214_v25 }
0x119f   :  { %2758 = vpow2.f32 %v2328_v24 }
0x11a7   :  { %v2757_v20 = vpop.eup %2756 }
0x11a8   :  { %1248 = vrot.lane.b32.xlu1 %v2757_v20, %s2961_s4 }
0x11a9   :  { %v2759_v27 = vpop.eup %2758 }
0x11aa   :  { %v1242_v28 = vadd.f32 1.0, %v2759_v27 }
0x11ac   :  { %2760 = vrcp.f32 %v1242_v28 }
0x11b6   :  { %v2761_v29 = vpop.eup %2760 }
0x11b7   :  { %v1246_v35 = vmul.f32 %v2761_v29, %v3376_v38 }
0x11bf   :  { %v1122_v55 = vpop.permute.xlu0 %1121 }
0x11c0   :  { %2522 = vmatmul.mubr.msk.bf16.vlgmr.msra.gmra.mrb[24].mxu0 %vm305_vm4, %v1122_v55 }
0x11c1   :  { %2534 = vmatpush3.bf16.msra.mxu0 %v3137_v47  ;;  %2537 = vmatprep.mubr.msk.bf16.mxu0 %vm2963_vm3, %v2962_v48 }
0x11c2   :  { %2535 = vmatprep.subr.bf16.mxu0 %v2962_v48 }
0x11c5   :  { %2536 = vmatpush3.bf16.msra.mxu0 %v3146_v49 }
0x121a   :  { %v1249_v31 = vpop.permute.xlu1 %1248 }
0x121b   :  { %v1251_v32 = vmul.f32 %v2761_v29, %v1249_v31 }
0x121d   :  { %1253 = vrot.lane.b32.xlu1 %v1251_v32, %s2961_s4 }
0x128f   :  { %v1254_v47 = vpop.permute.xlu1 %1253 }
0x1290   :  { %v3417_v37 = vadd.f32 %v1254_v47, %v1246_v35  ;;  %v223_v35 = vadd.f32 %v3119_v23, %v3103_v14  ;;  %v2645_v14 = vld [vmem:[%s3686_s5 + $0x10] ss:$8 sps:$4 sm:$0xff]  }
0x1292   :  { %2762 = vtanh.f32 %v3417_v37 }
0x1293   :  { %v1160_v49 = vpop.f32.mrb[24].mxu0 }
0x1294   :  { %v1166_v41 = vadd.f32 %v1160_v49, %v219_v40  ;;  %v2523_v34 = vpop.f32.mrb[25].mxu0 }
0x1295   :  { %v1163_v42 = vpop.f32.mrb[26].mxu0 }
0x1296   :  { %2764 = vtanh.f32 %v1166_v41  ;;  %v2524_v39 = vpop.f32.mrb[27].mxu0  ;;  %v2327_v38 = vmul.f32 -1.442695, %v1166_v41  ;;  %v2642_v42 = vld [vmem:[%s3686_s5] ss:$8 sps:$4 sm:$0xff]  }
0x1297   :  { %v2647_v39 = vld [vmem:[%s3686_s5 + $0x14] ss:$8 sps:$4 sm:$0xff]  }
0x1298   :  { %2766 = vpow2.f32 %v2327_v38  ;;  %v2653_v38 = vld [vmem:[%s3686_s5 + $0x34] ss:$8 sps:$4 sm:$0xff]  }
0x129c   :  { %v2763_v30 = vpop.eup %2762 }
0x129d   :  { %1259 = vrot.lane.b32.xlu1 %v2763_v30, %s2961_s4  ;;  %v2648_v30 = vld [vmem:[%s3686_s5 + $0x20] ss:$8 sps:$4 sm:$0xff]  }
0x12a0   :  { %v2765_v57 = vpop.eup %2764 }
0x12a1   :  { %1224 = vrot.lane.b32.xlu0 %v2765_v57, %s2961_s4  ;;  %v2650_v57 = vld [vmem:[%s3686_s5 + $0x24] ss:$8 sps:$4 sm:$0xff]  }
0x12a2   :  { %v2767_v46 = vpop.eup %2766 }
0x12a3   :  { %v1218_v33 = vadd.f32 1.0, %v2767_v46 }
0x12a5   :  { %2768 = vrcp.f32 %v1218_v33 }
0x12af   :  { %v2769_v2 = vpop.eup %2768 }
0x12b0   :  { %v1222_v6 = vmul.f32 %v2769_v2, %v3394_v13  ;;  %v191_v13 = vadd.f32 %v3109_v19, %v3115_v21 }
0x130f   :  { %v1260_v17 = vpop.permute.xlu1 %1259 }
0x1310   :  { %v3424_v63 = vmul.f32 %v2761_v29, %v1260_v17 }
0x1312   :  { %v1323_v52 = vpack.c.bf16 %v3424_v63, %v3424_v63 }
0x1313   :  { %v1225_v61 = vpop.permute.xlu0 %1224 }
0x1314   :  { %v1227_v3 = vmul.f32 %v2769_v2, %v1225_v61  ;;  %1325 = vrot.lane.b32.xlu1 %v1323_v52, %s2956_s29 }
0x1316   :  { %1229 = vrot.lane.b32.xlu0 %v1227_v3, %s2961_s4 }
0x1386   :  { %v1326_v36 = vpop.permute.xlu1 %1325 }
0x1387   :  { %2546 = vmatmul.mubr.msk.bf16.vlgmr.msra.gmra.mrb[36].mxu1 %vm305_vm4, %v1326_v36  ;;  %v3496_v36 = vld [vmem:[%s3689_s8] sm:$0x3] }
0x1388   :  { %v1230_v62 = vpop.permute.xlu0 %1229  ;;  %2553 = vmatprep.mubr.msk.bf16.mxu1 %vm2963_vm3, %v2962_v48 }
0x1389   :  { %v3434_v9 = vadd.f32 %v1230_v62, %v1222_v6  ;;  %v3501_v6 = vrot.slane %v3496_v36, %v95_v12 }
0x138b   :  { %2770 = vtanh.f32 %v3434_v9 }
0x1395   :  { %v2771_v5 = vpop.eup %2770 }
0x1396   :  { %1235 = vrot.lane.b32.xlu0 %v2771_v5, %s2961_s4 }
0x1408   :  { %v1236_v16 = vpop.permute.xlu0 %1235 }
0x1409   :  { %v3438_v8 = vmul.f32 %v2769_v2, %v1236_v16 }
0x140b   :  { %v1275_v58 = vpack.c.bf16 %v3438_v8, %v3438_v8 }
0x140d   :  { %1277 = vrot.lane.b32.xlu0 %v1275_v58, %s2956_s29 }
0x1411   :  { %484 = vrot.lane.b32.xlu0 %v3215_v45, %s2956_s29 }
0x145a   :  { %v1364_v1 = vpop.f32.mrb[36].mxu1 }
0x145b   :  { %v1370_v22 = vadd.f32 %v1364_v1, %v191_v13  ;;  %v2547_v25 = vpop.f32.mrb[37].mxu1 }
0x145c   :  { %v1367_v59 = vpop.f32.mrb[38].mxu1 }
0x145d   :  { %2772 = vtanh.f32 %v1370_v22  ;;  %v2548_v60 = vpop.f32.mrb[39].mxu1  ;;  %v2332_v45 = vmul.f32 -1.442695, %v1370_v22 }
0x145f   :  { %2774 = vpow2.f32 %v2332_v45 }
0x1467   :  { %v2773_v26 = vpop.eup %2772 }
0x1468   :  { %1404 = vrot.lane.b32.xlu1 %v2773_v26, %s2961_s4 }
0x1469   :  { %v2775_v19 = vpop.eup %2774 }
0x146a   :  { %v1398_v21 = vadd.f32 1.0, %v2775_v19  ;;  %v3506_v19 = vld [vmem:[#allocation7] sm:$0xff]  }
0x146b   :  { %2550 = vmatpush3.bf16.msra.mxu1 %v3506_v19 }
0x146c   :  { %2776 = vrcp.f32 %v1398_v21  ;;  %v3509_v21 = vld [vmem:[#allocation7 + $0x8] sm:$0xff]   ;;  %2551 = vmatprep.subr.bf16.mxu1 %v2962_v48 }
0x146f   :  { %2552 = vmatpush3.bf16.msra.mxu1 %v3509_v21 }
0x1470   :  { %2557 = vmatprep.subr.bf16.mxu1 %v2962_v48 }
0x1476   :  { %v2777_v24 = vpop.eup %2776 }
0x1477   :  { %v1402_v29 = vmul.f32 %v2777_v24, %v3417_v37  ;;  %v2644_v37 = vld [vmem:[%s3686_s5 + $0x4] ss:$8 sps:$4 sm:$0xff]  }
0x1478   :  { %1514 = vmatprep.subr.bf16.mxu0 %v2644_v37 }
0x147f   :  { %v1278_v20 = vpop.permute.xlu0 %1277 }
0x1480   :  { %2538 = vmatmul.mubr.msk.bf16.vlgmr.msra.gmra.mrb[28].mxu0 %vm305_vm4, %v1278_v20 }
0x1481   :  { %1546 = vmatprep.mubr.bf16.mxu0 %v2959_v0  ;;  %1515 = vmatpush1.bf16.msra.mxu0 %v2642_v42 }
0x1482   :  { %1516 = vmatprep.subr.bf16.mxu0 %v2647_v39 }
0x1483   :  { %v485_v55 = vpop.permute.xlu0 %484 }
0x1484   :  { %487 = vst.msk [vmem:[#allocation3 + $0x8] sm:$0xff] %vm305_vm4, %v485_v55 }
0x1485   :  { %1517 = vmatpush1.bf16.msra.mxu0 %v2645_v14 }
0x1486   :  { %1518 = vmatprep.subr.bf16.mxu0 %v2650_v57 }
0x1489   :  { %1519 = vmatpush1.bf16.msra.mxu0 %v2648_v30 }
0x148a   :  { %1520 = vmatprep.subr.bf16.mxu0 %v2653_v38 }
0x14da   :  { %v1405_v27 = vpop.permute.xlu1 %1404 }
0x14db   :  { %v1407_v28 = vmul.f32 %v2777_v24, %v1405_v27 }
0x14dd   :  { %1409 = vrot.lane.b32.xlu1 %v1407_v28, %s2961_s4 }
0x154f   :  { %v1410_v31 = vpop.permute.xlu1 %1409 }
0x1550   :  { %v1412_v32 = vadd.f32 %v1410_v31, %v1402_v29 }
0x1552   :  { %2778 = vtanh.f32 %v1412_v32 }
0x1553   :  { %v1316_v47 = vpop.f32.mrb[28].mxu0 }
0x1554   :  { %v3455_v40 = vadd.f32 %v1316_v47, %v223_v35  ;;  %v2539_v49 = vpop.f32.mrb[29].mxu0 }
0x1555   :  { %v1319_v41 = vpop.f32.mrb[30].mxu0 }
0x1556   :  { %v2540_v34 = vpop.f32.mrb[31].mxu0 }
0x155c   :  { %v2779_v23 = vpop.eup %2778 }
0x155d   :  { %1415 = vrot.lane.b32.xlu1 %v2779_v23, %s2961_s4 }
0x1561   :  { %302 = vrot.lane.b32.xlu1 %v3158_v53, %s2956_s29  ;;  %v2651_v53 = vld [vmem:[%s3686_s5 + $0x30] ss:$8 sps:$4 sm:$0xff]  }
0x1562   :  { %1521 = vmatpush1.bf16.msra.mxu0 %v2651_v53 }
0x1563   :  { %2589 = vmatprep.subr.bf16.mxu0 %v2962_v48 }
0x1565   :  { %1269 = vrot.lane.b32.xlu1 %v3424_v63, %s2964_s21 }
0x15cf   :  { %v1416_v46 = vpop.permute.xlu1 %1415 }
0x15d0   :  { %v1418_v33 = vmul.f32 %v2777_v24, %v1416_v46 }
0x15d2   :  { %1425 = vrot.lane.b32.xlu0 %v1418_v33, %s2964_s21 }
0x15d3   :  { %v303_v17 = vpop.permute.xlu1 %302 }
0x15d4   :  { %306 = vst.msk [vmem:[#allocation3] sm:$0xff] %vm305_vm4, %v303_v17 }
0x15d7   :  { %v1270_v63 = vpop.permute.xlu1 %1269 }
0x15d8   :  { %1272 = vst.msk [vmem:[#allocation3 + $0x8] sm:$0xff] %vm311_vm5, %v1270_v63 }
0x15df   :  { %v1430_v61 = vld [vmem:[#allocation3 + $0x8] sm:$0xff] }
0x1644   :  { %v1426_v52 = vpop.permute.xlu0 %1425 }
0x1645   :  { %1428 = vst.msk [vmem:[#allocation3] sm:$0xff] %vm311_vm5, %v1426_v52 }
0x164c   :  { %v1429_v2 = vld [vmem:[#allocation3] sm:$0xff] }
0x164d   :  { %v1437_v3 = vpack.c.bf16 %v1430_v61, %v1429_v2 }
0x164f   :  { %2341 = vmatmul.mubr.msk.bf16.vlgmr.msra.gmra.mrb[32].mxu0 %vm1501_vm6, %v1437_v3 }
0x1650   :  { %1556 = vmatprep.mubr.bf16.mxu0 %v2959_v0  ;;  %2590 = vmatpush3.bf16.msra.mxu0 %v3506_v19 }
0x1651   :  { %2591 = vmatprep.subr.bf16.mxu0 %v2962_v48 }
0x1654   :  { %2592 = vmatpush3.bf16.msra.mxu0 %v3509_v21 }
0x1655   :  { %2605 = vmatprep.subr.bf16.mxu0 %v2962_v48 }
0x1722   :  { %v1548_v62 = vpop.f32.mrb[32].mxu0 }
0x1723   :  { %v1549_v5 = vadd.f32 %v1548_v62, %v3501_v6  ;;  %v1550_v16 = vpop.f32.mrb[33].mxu0 }
0x1724   :  { %v1552_v58 = vpop.f32.mrb[34].mxu0 }
0x1725   :  { %2780 = vtanh.f32 %v1549_v5  ;;  %v1554_v13 = vpop.f32.mrb[35].mxu0  ;;  %v2345_v22 = vmul.f32 -1.442695, %v1549_v5  ;;  %v1553_v32 = vadd.f32 %v1552_v58, %v3501_v6 }
0x1727   :  { %2782 = vpow2.f32 %v2345_v22 }
0x172f   :  { %v2781_v1 = vpop.eup %2780 }
0x1730   :  { %1618 = vrot.lane.b32.xlu1 %v2781_v1, %s2961_s4 }
0x1731   :  { %v2783_v25 = vpop.eup %2782 }
0x1732   :  { %v1612_v59 = vadd.f32 1.0, %v2783_v25 }
0x1734   :  { %2784 = vrcp.f32 %v1612_v59 }
0x173e   :  { %v2785_v60 = vpop.eup %2784 }
0x173f   :  { %v1616_v12 = vmul.f32 0.0, %v2785_v60 }
0x17a2   :  { %v1619_v26 = vpop.permute.xlu1 %1618 }
0x17a3   :  { %v1621_v20 = vmul.f32 %v2785_v60, %v1619_v26 }
0x17a5   :  { %1623 = vrot.lane.b32.xlu0 %v1621_v20, %s2961_s4 }
0x1817   :  { %v1624_v55 = vpop.permute.xlu0 %1623 }
0x1818   :  { %v1626_v45 = vadd.f32 %v1624_v55, %v1616_v12 }
0x181a   :  { %2786 = vtanh.f32 %v1626_v45 }
0x1824   :  { %v2787_v24 = vpop.eup %2786 }
0x1825   :  { %1629 = vrot.lane.b32.xlu1 %v2787_v24, %s2961_s4 }
0x1897   :  { %v1630_v27 = vpop.permute.xlu1 %1629 }
0x1898   :  { %v1632_v28 = vmul.f32 %v2785_v60, %v1630_v27 }
0x189a   :  { %v1658_v29 = vpack.c.bf16 %v1632_v28, %v1632_v28 }
0x189c   :  { %1660 = vrot.lane.b32.xlu0 %v1658_v29, %s2956_s29 }
0x190e   :  { %v1661_v31 = vpop.permute.xlu0 %1660 }
0x190f   :  { %2554 = vmatmul.mubr.msk.bf16.vlgmr.msra.gmra.mrb[40].mxu1 %vm305_vm4, %v1661_v31 }
0x1910   :  { %2558 = vmatpush3.bf16.msra.mxu1 %v3506_v19  ;;  %2561 = vmatprep.mubr.msk.bf16.mxu1 %vm2963_vm3, %v2962_v48 }
0x1911   :  { %2559 = vmatprep.subr.bf16.mxu1 %v2962_v48 }
0x1914   :  { %2560 = vmatpush3.bf16.msra.mxu1 %v3509_v21 }
0x1915   :  { %2565 = vmatprep.subr.bf16.mxu1 %v2962_v48 }
0x19e2   :  { %v1711_v35 = vpop.f32.mrb[40].mxu1 }
0x19e3   :  { %v1717_v47 = vadd.f32 %v1711_v35, %v1553_v32  ;;  %v2555_v49 = vpop.f32.mrb[41].mxu1 }
0x19e4   :  { %v1714_v41 = vpop.f32.mrb[42].mxu1 }
0x19e5   :  { %2788 = vtanh.f32 %v1717_v47  ;;  %v2556_v34 = vpop.f32.mrb[43].mxu1  ;;  %v2350_v37 = vmul.f32 -1.442695, %v1717_v47 }
0x19e7   :  { %2790 = vpow2.f32 %v2350_v37 }
0x19ef   :  { %v2789_v42 = vpop.eup %2788 }
0x19f0   :  { %1727 = vrot.lane.b32.xlu1 %v2789_v42, %s2961_s4 }
0x19f1   :  { %v2791_v39 = vpop.eup %2790 }
0x19f2   :  { %v1721_v14 = vadd.f32 1.0, %v2791_v39 }
0x19f4   :  { %2792 = vrcp.f32 %v1721_v14 }
0x19fe   :  { %v2793_v23 = vpop.eup %2792 }
0x19ff   :  { %v1725_v38 = vmul.f32 %v2793_v23, %v1626_v45 }
0x1a62   :  { %v1728_v30 = vpop.permute.xlu1 %1727 }
0x1a63   :  { %v1730_v57 = vmul.f32 %v2793_v23, %v1728_v30 }
0x1a65   :  { %1732 = vrot.lane.b32.xlu0 %v1730_v57, %s2961_s4 }
0x1a69   :  { %640 = vrot.lane.b32.xlu0 %v3276_v4, %s2956_s29 }
0x1a6d   :  { %957 = vrot.lane.b32.xlu0 %v3341_v50, %s2964_s21 }
0x1ad7   :  { %v1733_v53 = vpop.permute.xlu0 %1732 }
0x1ad8   :  { %v1735_v46 = vadd.f32 %v1733_v53, %v1725_v38 }
0x1ada   :  { %2794 = vtanh.f32 %v1735_v46 }
0x1adb   :  { %v641_v33 = vpop.permute.xlu0 %640 }
0x1adc   :  { %643 = vst.msk [vmem:[#allocation3 + $0x10] sm:$0xff] %vm305_vm4, %v641_v33 }
0x1adf   :  { %v958_v2 = vpop.permute.xlu0 %957 }
0x1ae4   :  { %v2795_v17 = vpop.eup %2794 }
0x1ae5   :  { %1738 = vrot.lane.b32.xlu1 %v2795_v17, %s2961_s4 }
0x1ae9   :  { %796 = vrot.lane.b32.xlu1 %v3317_v7, %s2956_s29 }
0x1aed   :  { %1113 = vrot.lane.b32.xlu1 %v3383_v54, %s2964_s21 }
0x1b57   :  { %v1739_v4 = vpop.permute.xlu1 %1738 }
0x1b58   :  { %v1741_v63 = vmul.f32 %v2793_v23, %v1739_v4 }
0x1b5a   :  { %v1743_v52 = vpack.c.bf16 %v1741_v63, %v1741_v63 }
0x1b5b   :  { %v797_v50 = vpop.permute.xlu1 %796 }
0x1b5c   :  { %799 = vst.msk [vmem:[#allocation3 + $0x18] sm:$0xff] %vm305_vm4, %v797_v50  ;;  %1745 = vrot.lane.b32.xlu0 %v1743_v52, %s2956_s29 }
0x1b5d   :  { %960 = vst.msk [vmem:[#allocation3 + $0x18] sm:$0xff] %vm311_vm5, %v958_v2 }
0x1b5f   :  { %v1114_v61 = vpop.permute.xlu1 %1113 }
0x1b60   :  { %1116 = vst.msk [vmem:[#allocation3 + $0x10] sm:$0xff] %vm311_vm5, %v1114_v61 }
0x1b64   :  { %v1432_v62 = vld [vmem:[#allocation3 + $0x18] sm:$0xff] }
0x1b67   :  { %v1431_v3 = vld [vmem:[#allocation3 + $0x10] sm:$0xff] }
0x1b68   :  { %v1438_v7 = vpack.c.bf16 %v1432_v62, %v1431_v3 }
0x1b6a   :  { %2342 = vmatmul.mubr.msk.bf16.gmra.mrb[36].mxu0 %vm1501_vm6, %v1438_v7 }
0x1b6b   :  { %1566 = vmatprep.mubr.bf16.mxu0 %v2959_v0 }
0x1bce   :  { %v1746_v54 = vpop.permute.xlu0 %1745 }
0x1bcf   :  { %2562 = vmatmul.mubr.msk.bf16.vlgmr.msra.gmra.mrb[44].mxu1 %vm305_vm4, %v1746_v54 }
0x1bd0   :  { %2566 = vmatpush3.bf16.msra.mxu1 %v3506_v19  ;;  %2569 = vmatprep.mubr.msk.bf16.mxu1 %vm2963_vm3, %v2962_v48 }
0x1bd1   :  { %2567 = vmatprep.subr.bf16.mxu1 %v2962_v48 }
0x1bd4   :  { %2568 = vmatpush3.bf16.msra.mxu1 %v3509_v21 }
0x1bd5   :  { %2573 = vmatprep.subr.bf16.mxu1 %v2962_v48 }
0x1c3d   :  { %v1558_v5 = vpop.f32.mrb[36].mxu0 }
0x1c3e   :  { %v1560_v16 = vpop.f32.mrb[37].mxu0  ;;  %v1559_v1 = vadd.f32 %v1558_v5, %v3501_v6 }
0x1c3f   :  { %v1562_v58 = vpop.f32.mrb[38].mxu0 }
0x1c40   :  { %v1564_v13 = vpop.f32.mrb[39].mxu0  ;;  %v1563_v42 = vadd.f32 %v1562_v58, %v3501_v6 }
0x1ca2   :  { %v1784_v22 = vpop.f32.mrb[44].mxu1 }
0x1ca3   :  { %v1790_v25 = vadd.f32 %v1784_v22, %v1559_v1  ;;  %v2563_v59 = vpop.f32.mrb[45].mxu1 }
0x1ca4   :  { %v1787_v60 = vpop.f32.mrb[46].mxu1 }
0x1ca5   :  { %2796 = vtanh.f32 %v1790_v25  ;;  %v2564_v26 = vpop.f32.mrb[47].mxu1  ;;  %v2352_v12 = vmul.f32 -1.442695, %v1790_v25 }
0x1ca7   :  { %2798 = vpow2.f32 %v2352_v12 }
0x1caf   :  { %v2797_v20 = vpop.eup %2796 }
0x1cb0   :  { %1800 = vrot.lane.b32.xlu1 %v2797_v20, %s2961_s4 }
0x1cb1   :  { %v2799_v55 = vpop.eup %2798 }
0x1cb2   :  { %v1794_v45 = vadd.f32 1.0, %v2799_v55 }
0x1cb4   :  { %2800 = vrcp.f32 %v1794_v45 }
0x1cbe   :  { %v2801_v24 = vpop.eup %2800 }
0x1cbf   :  { %v1798_v29 = vmul.f32 %v2801_v24, %v1735_v46 }
0x1d22   :  { %v1801_v27 = vpop.permute.xlu1 %1800 }
0x1d23   :  { %v1803_v28 = vmul.f32 %v2801_v24, %v1801_v27 }
0x1d25   :  { %1805 = vrot.lane.b32.xlu0 %v1803_v28, %s2961_s4 }
0x1d97   :  { %v1806_v31 = vpop.permute.xlu0 %1805 }
0x1d98   :  { %v1808_v32 = vadd.f32 %v1806_v31, %v1798_v29 }
0x1d9a   :  { %2802 = vtanh.f32 %v1808_v32 }
0x1da4   :  { %v2803_v35 = vpop.eup %2802 }
0x1da5   :  { %1811 = vrot.lane.b32.xlu1 %v2803_v35, %s2961_s4 }
0x1e17   :  { %v1812_v47 = vpop.permute.xlu1 %1811 }
0x1e18   :  { %v1814_v49 = vmul.f32 %v2801_v24, %v1812_v47 }
0x1e1a   :  { %v1816_v41 = vpack.c.bf16 %v1814_v49, %v1814_v49 }
0x1e1c   :  { %1818 = vrot.lane.b32.xlu0 %v1816_v41, %s2956_s29  ;;  %v2331_v41 = vmul.f32 -1.442695, %v3455_v40 }
0x1e8e   :  { %v1819_v34 = vpop.permute.xlu0 %1818 }
0x1e8f   :  { %2570 = vmatmul.mubr.msk.bf16.vlgmr.msra.gmra.mrb[48].mxu1 %vm305_vm4, %v1819_v34 }
0x1e90   :  { %2574 = vmatpush3.bf16.msra.mxu1 %v3506_v19  ;;  %2577 = vmatprep.mubr.msk.bf16.mxu1 %vm2963_vm3, %v2962_v48 }
0x1e91   :  { %2575 = vmatprep.subr.bf16.mxu1 %v2962_v48 }
0x1e94   :  { %2576 = vmatpush3.bf16.msra.mxu1 %v3509_v21 }
0x1e95   :  { %2581 = vmatprep.subr.bf16.mxu1 %v2962_v48 }
0x1f62   :  { %v1857_v37 = vpop.f32.mrb[48].mxu1 }
0x1f63   :  { %v1863_v39 = vadd.f32 %v1857_v37, %v1563_v42  ;;  %v2571_v14 = vpop.f32.mrb[49].mxu1 }
0x1f64   :  { %v1860_v23 = vpop.f32.mrb[50].mxu1 }
0x1f65   :  { %2804 = vtanh.f32 %v1863_v39  ;;  %v2572_v30 = vpop.f32.mrb[51].mxu1  ;;  %v2354_v38 = vmul.f32 -1.442695, %v1863_v39 }
0x1f67   :  { %2806 = vpow2.f32 %v2354_v38 }
0x1f6f   :  { %v2805_v57 = vpop.eup %2804 }
0x1f70   :  { %1873 = vrot.lane.b32.xlu1 %v2805_v57, %s2961_s4 }
0x1f71   :  { %v2807_v53 = vpop.eup %2806 }
0x1f72   :  { %v1867_v46 = vadd.f32 1.0, %v2807_v53 }
0x1f74   :  { %2808 = vrcp.f32 %v1867_v46 }
0x1f7e   :  { %v2809_v33 = vpop.eup %2808 }
0x1f7f   :  { %v1871_v63 = vmul.f32 %v2809_v33, %v1808_v32 }
0x1fe2   :  { %v1874_v17 = vpop.permute.xlu1 %1873 }
0x1fe3   :  { %v1876_v4 = vmul.f32 %v2809_v33, %v1874_v17 }
0x1fe5   :  { %1878 = vrot.lane.b32.xlu0 %v1876_v4, %s2961_s4 }
0x1fe9   :  { %645 = vrot.lane.b32.xlu0 %v3258_v43, %s2964_s21 }
0x1fed   :  { %952 = vrot.lane.b32.xlu0 %v3359_v10, %s2956_s29 }
0x2057   :  { %v1879_v52 = vpop.permute.xlu0 %1878 }
0x2058   :  { %v1881_v50 = vadd.f32 %v1879_v52, %v1871_v63 }
0x205a   :  { %2810 = vtanh.f32 %v1881_v50 }
0x205b   :  { %v646_v2 = vpop.permute.xlu0 %645 }
0x205c   :  { %648 = vst.msk [vmem:[#allocation3 + $0x28] sm:$0xff] %vm311_vm5, %v646_v2 }
0x205f   :  { %v953_v7 = vpop.permute.xlu0 %952 }
0x2064   :  { %v2811_v61 = vpop.eup %2810 }
0x2065   :  { %1884 = vrot.lane.b32.xlu1 %v2811_v61, %s2961_s4 }
0x2069   :  { %801 = vrot.lane.b32.xlu1 %v3299_v44, %s2964_s21 }
0x206d   :  { %1108 = vrot.lane.b32.xlu1 %v3401_v18, %s2956_s29 }
0x20d7   :  { %v1885_v43 = vpop.permute.xlu1 %1884 }
0x20d8   :  { %v1887_v3 = vmul.f32 %v2809_v33, %v1885_v43 }
0x20da   :  { %v1889_v62 = vpack.c.bf16 %v1887_v3, %v1887_v3 }
0x20db   :  { %v802_v10 = vpop.permute.xlu1 %801 }
0x20dc   :  { %804 = vst.msk [vmem:[#allocation3 + $0x20] sm:$0xff] %vm311_vm5, %v802_v10  ;;  %1891 = vrot.lane.b32.xlu0 %v1889_v62, %s2956_s29 }
0x20dd   :  { %955 = vst.msk [vmem:[#allocation3 + $0x20] sm:$0xff] %vm305_vm4, %v953_v7 }
0x20df   :  { %v1109_v54 = vpop.permute.xlu1 %1108 }
0x20e0   :  { %1111 = vst.msk [vmem:[#allocation3 + $0x28] sm:$0xff] %vm305_vm4, %v1109_v54 }
0x20e4   :  { %v1433_v5 = vld [vmem:[#allocation3 + $0x20] sm:$0xff] }
0x20e7   :  { %v1434_v16 = vld [vmem:[#allocation3 + $0x28] sm:$0xff] }
0x20e8   :  { %v1439_v44 = vpack.c.bf16 %v1434_v16, %v1433_v5 }
0x20ea   :  { %2343 = vmatmul.mubr.msk.bf16.gmra.mrb[40].mxu0 %vm1501_vm6, %v1439_v44 }
0x20eb   :  { %1576 = vmatprep.mubr.bf16.mxu0 %v2959_v0 }
0x214e   :  { %v1892_v18 = vpop.permute.xlu0 %1891 }
0x214f   :  { %2578 = vmatmul.mubr.msk.bf16.vlgmr.msra.gmra.mrb[52].mxu1 %vm305_vm4, %v1892_v18 }
0x2150   :  { %2582 = vmatpush3.bf16.msra.mxu1 %v3506_v19  ;;  %2585 = vmatprep.mubr.msk.bf16.mxu1 %vm2963_vm3, %v2962_v48 }
0x2151   :  { %2583 = vmatprep.subr.bf16.mxu1 %v2962_v48 }
0x2154   :  { %2584 = vmatpush3.bf16.msra.mxu1 %v3509_v21 }
0x2155   :  { %2597 = vmatprep.subr.bf16.mxu1 %v2962_v48 }
0x21bd   :  { %v1568_v58 = vpop.f32.mrb[40].mxu0 }
0x21be   :  { %v1570_v13 = vpop.f32.mrb[41].mxu0  ;;  %v1569_v0 = vadd.f32 %v1568_v58, %v3501_v6 }
0x21bf   :  { %v1572_v1 = vpop.f32.mrb[42].mxu0 }
0x21c0   :  { %v1574_v22 = vpop.f32.mrb[43].mxu0  ;;  %v1573_v17 = vadd.f32 %v1572_v1, %v3501_v6 }
0x2222   :  { %v1930_v25 = vpop.f32.mrb[52].mxu1 }
0x2223   :  { %v1936_v59 = vadd.f32 %v1930_v25, %v1569_v0  ;;  %v2579_v60 = vpop.f32.mrb[53].mxu1 }
0x2224   :  { %v1933_v26 = vpop.f32.mrb[54].mxu1 }
0x2225   :  { %2812 = vtanh.f32 %v1936_v59  ;;  %v2580_v20 = vpop.f32.mrb[55].mxu1  ;;  %v2356_v55 = vmul.f32 -1.442695, %v1936_v59 }
0x2227   :  { %2814 = vpow2.f32 %v2356_v55 }
0x222f   :  { %v2813_v12 = vpop.eup %2812 }
0x2230   :  { %1946 = vrot.lane.b32.xlu1 %v2813_v12, %s2961_s4 }
0x2231   :  { %v2815_v45 = vpop.eup %2814 }
0x2232   :  { %v1940_v24 = vadd.f32 1.0, %v2815_v45 }
0x2234   :  { %2816 = vrcp.f32 %v1940_v24 }
0x223e   :  { %v2817_v27 = vpop.eup %2816 }
0x223f   :  { %v1944_v31 = vmul.f32 %v2817_v27, %v1881_v50 }
0x22a2   :  { %v1947_v28 = vpop.permute.xlu1 %1946 }
0x22a3   :  { %v1949_v29 = vmul.f32 %v2817_v27, %v1947_v28 }
0x22a5   :  { %1951 = vrot.lane.b32.xlu0 %v1949_v29, %s2961_s4 }
0x2317   :  { %v1952_v32 = vpop.permute.xlu0 %1951 }
0x2318   :  { %v1954_v35 = vadd.f32 %v1952_v32, %v1944_v31 }
0x231a   :  { %2818 = vtanh.f32 %v1954_v35 }
0x231b   :  { %2820 = vtanh.f32 %v3455_v40 }
0x231c   :  { %2822 = vpow2.f32 %v2331_v41 }
0x2324   :  { %v2819_v47 = vpop.eup %2818 }
0x2325   :  { %1957 = vrot.lane.b32.xlu1 %v2819_v47, %s2961_s4  ;;  %v2821_v49 = vpop.eup %2820 }
0x2326   :  { %v2823_v34 = vpop.eup %2822 }
0x2327   :  { %v1374_v42 = vadd.f32 1.0, %v2823_v34 }
0x2329   :  { %1380 = vrot.lane.b32.xlu1 %v2821_v49, %s2961_s4  ;;  %2824 = vrcp.f32 %v1374_v42  ;;  %v1458_v42 = vrot.slane %v3496_v36, %v99_v15 }
0x2333   :  { %v2825_v23 = vpop.eup %2824 }
0x2334   :  { %v1378_v53 = vmul.f32 %v2825_v23, %v3434_v9 }
0x2397   :  { %v1958_v37 = vpop.permute.xlu1 %1957 }
0x2398   :  { %v1960_v39 = vmul.f32 %v2817_v27, %v1958_v37 }
0x239a   :  { %v1962_v14 = vpack.c.bf16 %v1960_v39, %v1960_v39 }
0x239b   :  { %v1381_v30 = vpop.permute.xlu1 %1380 }
0x239c   :  { %v1383_v57 = vmul.f32 %v2825_v23, %v1381_v30  ;;  %1964 = vrot.lane.b32.xlu0 %v1962_v14, %s2956_s29 }
0x239e   :  { %1385 = vrot.lane.b32.xlu1 %v1383_v57, %s2961_s4 }
0x240e   :  { %v1965_v38 = vpop.permute.xlu0 %1964 }
0x240f   :  { %2586 = vmatmul.mubr.msk.bf16.vlgmr.msra.gmra.mrb[56].mxu1 %vm305_vm4, %v1965_v38 }
0x2410   :  { %v1386_v40 = vpop.permute.xlu1 %1385  ;;  %2598 = vmatpush3.bf16.msra.mxu1 %v3506_v19  ;;  %2601 = vmatprep.mubr.msk.bf16.mxu1 %vm2963_vm3, %v2962_v48 }
0x2411   :  { %v1388_v46 = vadd.f32 %v1386_v40, %v1378_v53  ;;  %2599 = vmatprep.subr.bf16.mxu1 %v2962_v48 }
0x2413   :  { %2826 = vtanh.f32 %v1388_v46 }
0x2414   :  { %2600 = vmatpush3.bf16.msra.mxu1 %v3509_v21 }
0x241d   :  { %v2827_v33 = vpop.eup %2826 }
0x241e   :  { %1391 = vrot.lane.b32.xlu1 %v2827_v33, %s2961_s4 }
0x2422   :  { %308 = vrot.lane.b32.xlu1 %v3162_v56, %s2964_s21 }
0x2426   :  { %1264 = vrot.lane.b32.xlu1 %v3438_v8, %s2956_s29 }
0x2490   :  { %v1392_v9 = vpop.permute.xlu1 %1391 }
0x2491   :  { %v1394_v16 = vmul.f32 %v2825_v23, %v1392_v9 }
0x2494   :  { %v309_v19 = vpop.permute.xlu1 %308 }
0x2495   :  { %312 = vst.msk [vmem:[#allocation3 + $0x38] sm:$0xff] %vm311_vm5, %v309_v19 }
0x2498   :  { %v1265_v1 = vpop.permute.xlu1 %1264 }
0x24e2   :  { %v2003_v4 = vpop.f32.mrb[56].mxu1 }
0x24e3   :  { %v2009_v63 = vadd.f32 %v2003_v4, %v1573_v17  ;;  %v2587_v52 = vpop.f32.mrb[57].mxu1 }
0x24e4   :  { %v2006_v50 = vpop.f32.mrb[58].mxu1 }
0x24e5   :  { %2828 = vtanh.f32 %v2009_v63  ;;  %v2588_v21 = vpop.f32.mrb[59].mxu1  ;;  %v2358_v61 = vmul.f32 -1.442695, %v2009_v63 }
0x24e7   :  { %2830 = vpow2.f32 %v2358_v61 }
0x24ef   :  { %v2829_v2 = vpop.eup %2828 }
0x24f0   :  { %2019 = vrot.lane.b32.xlu0 %v2829_v2, %s2961_s4 }
0x24f1   :  { %v2831_v56 = vpop.eup %2830 }
0x24f2   :  { %v2013_v43 = vadd.f32 1.0, %v2831_v56 }
0x24f4   :  { %2832 = vrcp.f32 %v2013_v43 }
0x24fe   :  { %v2833_v8 = vpop.eup %2832 }
0x24ff   :  { %v2017_v10 = vmul.f32 %v2833_v8, %v1954_v35 }
0x2562   :  { %v2020_v3 = vpop.permute.xlu0 %2019 }
0x2563   :  { %v2022_v62 = vmul.f32 %v2833_v8, %v2020_v3 }
0x2565   :  { %2024 = vrot.lane.b32.xlu0 %v2022_v62, %s2961_s4 }
0x25d7   :  { %v2025_v7 = vpop.permute.xlu0 %2024 }
0x25d8   :  { %v2027_v54 = vadd.f32 %v2025_v7, %v2017_v10 }
0x25da   :  { %2834 = vtanh.f32 %v2027_v54 }
0x25e4   :  { %v2835_v5 = vpop.eup %2834 }
0x25e5   :  { %2030 = vrot.lane.b32.xlu0 %v2835_v5, %s2961_s4 }
0x25e9   :  { %489 = vrot.lane.b32.xlu0 %v3220_v51, %s2964_s21 }
0x25ed   :  { %1420 = vrot.lane.b32.xlu0 %v1394_v16, %s2956_s29 }
0x2657   :  { %v2031_v44 = vpop.permute.xlu0 %2030 }
0x2658   :  { %v2033_v18 = vmul.f32 %v2833_v8, %v2031_v44 }
0x265a   :  { %v2035_v58 = vpack.c.bf16 %v2033_v18, %v2033_v18  ;;  %v2656_v18 = vld [vmem:[%s3690_s9] sm:$0xff]  }
0x265b   :  { %v490_v13 = vpop.permute.xlu0 %489 }
0x265c   :  { %492 = vst.msk [vmem:[#allocation3 + $0x30] sm:$0xff] %vm311_vm5, %v490_v13  ;;  %2037 = vrot.lane.b32.xlu1 %v2035_v58, %s2956_s29  ;;  %v2657_v58 = vld [vmem:[%s3690_s9 + $0x8] sm:$0xff]   ;;  %v2658_v13 = vld [vmem:[%s3690_s9 + $0x10] sm:$0xff]  }
0x265d   :  { %1267 = vst.msk [vmem:[#allocation3 + $0x30] sm:$0xff] %vm305_vm4, %v1265_v1 }
0x265f   :  { %v1421_v22 = vpop.permute.xlu0 %1420 }
0x2660   :  { %1423 = vst.msk [vmem:[#allocation3 + $0x38] sm:$0xff] %vm305_vm4, %v1421_v22 }
0x2664   :  { %v1435_v0 = vld [vmem:[#allocation3 + $0x30] sm:$0xff] }
0x2667   :  { %v1436_v25 = vld [vmem:[#allocation3 + $0x38] sm:$0xff] }
0x2668   :  { %v1440_v51 = vpack.c.bf16 %v1436_v25, %v1435_v0  ;;  %v2659_v25 = vld [vmem:[%s3690_s9 + $0x18] sm:$0xff]   ;;  %s2926_s9 = scalar_lea.vmem %s2280_s16, 128 }
0x2669   :  { %p2927_p10 = scmp.ne.s32.totalorder %s2280_s16, %s2926_s9  ;;  %p2932_p12 = scmp.lt.s32.totalorder %s2926_s9, %s2926_s9 }
0x266a   :  { %2344 = vmatmul.mubr.msk.bf16.gmra.mrb[44].mxu0 %vm1501_vm6, %v1440_v51 }
0x266b   :  { %2593 = vmatprep.mubr.msk.bf16.mxu0 %vm2963_vm3, %v2962_v48  ;;  %p2933_p13 = por %p2932_p12, %p2931_p11 }
0x266d   :  { %p2934_p0 = pnand %p2933_p13, %p2927_p10 }
0x26ce   :  { %v2038_v59 = vpop.permute.xlu1 %2037 }
0x26cf   :  { %2594 = vmatmul.mubr.msk.bf16.vlgmr.msra.gmra.mrb[48].mxu0 %vm305_vm4, %v2038_v59 }
0x26d0   :  { %2613 = vmatprep.mubr.msk.bf16.mxu0 %vm2963_vm3, %v2962_v48  ;;  %2606 = vmatpush3.bf16.msra.mxu0 %v2656_v18 }
0x26d1   :  { %2607 = vmatprep.subr.bf16.mxu0 %v2962_v48 }
0x26d4   :  { %2608 = vmatpush3.bf16.msra.mxu0 %v2657_v58 }
0x26d5   :  { %2609 = vmatprep.subr.bf16.mxu0 %v2962_v48 }
0x26d8   :  { %2610 = vmatpush3.bf16.msra.mxu0 %v2658_v13 }
0x26d9   :  { %2611 = vmatprep.subr.bf16.mxu0 %v2962_v48  ;;  %v2363_v48 = vld [vmem:[%s3691_s10] ss:$0 sm:$0xff] }
0x26dc   :  { %2612 = vmatpush3.bf16.msra.mxu0 %v2659_v25 }
0x273d   :  { %v1578_v60 = vpop.f32.mrb[44].mxu0 }
0x273e   :  { %v1580_v26 = vpop.f32.mrb[45].mxu0  ;;  %v1579_v55 = vadd.f32 %v1578_v60, %v3501_v6 }
0x273f   :  { %v1582_v20 = vpop.f32.mrb[46].mxu0 }
0x2740   :  { %v1584_v12 = vpop.f32.mrb[47].mxu0  ;;  %v1583_v50 = vadd.f32 %v1582_v20, %v3501_v6 }
0x2741   :  { %v1585_v23 = vadd.f32 %v1584_v12, %v1458_v42 }
0x2743   :  { %v2346_v38 = vmul.f32 -1.442695, %v1585_v23 }
0x27a2   :  { %v2076_v45 = vpop.f32.mrb[48].mxu0 }
0x27a3   :  { %v2082_v24 = vadd.f32 %v2076_v45, %v1579_v55  ;;  %v2595_v27 = vpop.f32.mrb[49].mxu0 }
0x27a4   :  { %v2079_v28 = vpop.f32.mrb[50].mxu0 }
0x27a5   :  { %2836 = vtanh.f32 %v2082_v24  ;;  %v2596_v29 = vpop.f32.mrb[51].mxu0  ;;  %v2360_v32 = vmul.f32 -1.442695, %v2082_v24 }
0x27a7   :  { %2838 = vpow2.f32 %v2360_v32 }
0x27af   :  { %v2837_v31 = vpop.eup %2836 }
0x27b0   :  { %2092 = vrot.lane.b32.xlu0 %v2837_v31, %s2961_s4 }
0x27b1   :  { %v2839_v35 = vpop.eup %2838 }
0x27b2   :  { %v2086_v47 = vadd.f32 1.0, %v2839_v35 }
0x27b4   :  { %2840 = vrcp.f32 %v2086_v47 }
0x27be   :  { %v2841_v49 = vpop.eup %2840 }
0x27bf   :  { %v2090_v37 = vmul.f32 %v2841_v49, %v2027_v54 }
0x2822   :  { %v2093_v41 = vpop.permute.xlu0 %2092 }
0x2823   :  { %v2095_v34 = vmul.f32 %v2841_v49, %v2093_v41 }
0x2825   :  { %2097 = vrot.lane.b32.xlu1 %v2095_v34, %s2961_s4 }
0x2897   :  { %v2098_v39 = vpop.permute.xlu1 %2097 }
0x2898   :  { %v2100_v14 = vadd.f32 %v2098_v39, %v2090_v37 }
0x289a   :  { %2842 = vtanh.f32 %v2100_v14 }
0x289b   :  { %2844 = vtanh.f32 %v1585_v23 }
0x289c   :  { %2846 = vpow2.f32 %v2346_v38 }
0x28a4   :  { %v2843_v30 = vpop.eup %2842 }
0x28a5   :  { %2103 = vrot.lane.b32.xlu0 %v2843_v30, %s2961_s4  ;;  %v2845_v57 = vpop.eup %2844 }
0x28a6   :  { %v2847_v53 = vpop.eup %2846 }
0x28a7   :  { %v1636_v40 = vadd.f32 1.0, %v2847_v53 }
0x28a9   :  { %1642 = vrot.lane.b32.xlu0 %v2845_v57, %s2961_s4  ;;  %2848 = vrcp.f32 %v1636_v40 }
0x28b3   :  { %v2849_v36 = vpop.eup %2848 }
0x28b4   :  { %v1640_v17 = vmul.f32 0.0, %v2849_v36 }
0x2917   :  { %v2104_v11 = vpop.permute.xlu0 %2103 }
0x2918   :  { %v2106_v46 = vmul.f32 %v2841_v49, %v2104_v11 }
0x291a   :  { %v2108_v15 = vpack.c.bf16 %v2106_v46, %v2106_v46 }
0x291b   :  { %v1643_v33 = vpop.permute.xlu0 %1642 }
0x291c   :  { %v1645_v9 = vmul.f32 %v2849_v36, %v1643_v33  ;;  %2110 = vrot.lane.b32.xlu1 %v2108_v15, %s2956_s29 }
0x291e   :  { %1647 = vrot.lane.b32.xlu0 %v1645_v9, %s2961_s4 }
0x298e   :  { %v2111_v19 = vpop.permute.xlu1 %2110 }
0x298f   :  { %2602 = vmatmul.mubr.msk.bf16.vlgmr.msra.gmra.mrb[60].mxu1 %vm305_vm4, %v2111_v19 }
0x2990   :  { %v1648_v4 = vpop.permute.xlu0 %1647 }
0x2991   :  { %v1650_v63 = vadd.f32 %v1648_v4, %v1640_v17 }
0x2993   :  { %2850 = vtanh.f32 %v1650_v63 }
0x299d   :  { %v2851_v52 = vpop.eup %2850 }
0x299e   :  { %1653 = vrot.lane.b32.xlu0 %v2851_v52, %s2961_s4 }
0x2a10   :  { %v1654_v22 = vpop.permute.xlu0 %1653 }
0x2a11   :  { %v1656_v0 = vmul.f32 %v2849_v36, %v1654_v22 }
0x2a62   :  { %v2149_v21 = vpop.f32.mrb[60].mxu1 }
0x2a63   :  { %v2155_v2 = vadd.f32 %v2149_v21, %v1583_v50  ;;  %v2603_v61 = vpop.f32.mrb[61].mxu1 }
0x2a64   :  { %v2152_v56 = vpop.f32.mrb[62].mxu1 }
0x2a65   :  { %2852 = vtanh.f32 %v2155_v2  ;;  %v2604_v43 = vpop.f32.mrb[63].mxu1  ;;  %v2362_v3 = vmul.f32 -1.442695, %v2155_v2 }
0x2a67   :  { %2854 = vpow2.f32 %v2362_v3 }
0x2a6f   :  { %v2853_v8 = vpop.eup %2852 }
0x2a70   :  { %2165 = vrot.lane.b32.xlu1 %v2853_v8, %s2961_s4 }
0x2a71   :  { %v2855_v62 = vpop.eup %2854 }
0x2a72   :  { %v2159_v10 = vadd.f32 1.0, %v2855_v62 }
0x2a74   :  { %2856 = vrcp.f32 %v2159_v10 }
0x2a7e   :  { %v2857_v7 = vpop.eup %2856 }
0x2a7f   :  { %v2163_v6 = vmul.f32 %v2857_v7, %v2100_v14 }
0x2ae2   :  { %v2166_v54 = vpop.permute.xlu1 %2165 }
0x2ae3   :  { %v2168_v5 = vmul.f32 %v2857_v7, %v2166_v54 }
0x2ae5   :  { %2170 = vrot.lane.b32.xlu1 %v2168_v5, %s2961_s4 }
0x2b57   :  { %v2171_v16 = vpop.permute.xlu1 %2170 }
0x2b58   :  { %v2173_v44 = vadd.f32 %v2171_v16, %v2163_v6 }
0x2b5a   :  { %2858 = vtanh.f32 %v2173_v44 }
0x2b64   :  { %v2859_v1 = vpop.eup %2858 }
0x2b65   :  { %2176 = vrot.lane.b32.xlu1 %v2859_v1, %s2961_s4 }
0x2b69   :  { %2185 = vrot.lane.b32.xlu1 %v1656_v0, %s2964_s21 }
0x2bd7   :  { %v2177_v51 = vpop.permute.xlu1 %2176 }
0x2bd8   :  { %v2179_v59 = vmul.f32 %v2857_v7, %v2177_v51 }
0x2bda   :  { %2181 = vrot.lane.b32.xlu0 %v2179_v59, %s2956_s29 }
0x2bdb   :  { %v2186_v60 = vpop.permute.xlu1 %2185 }
0x2c4c   :  { %v2182_v26 = vpop.permute.xlu0 %2181 }
0x2c4d   :  { %v2188_v20 = vsel %vm305_vm4, %v2182_v26, %v2186_v60 }
0x2c4e   :  { %v2189_v12 = vpack.c.bf16 %v2188_v20, %v2188_v20 }
0x2c50   :  { %2614 = vmatmul.mubr.msk.bf16.vlgmr.msra.gmra.mrb[52].mxu0 %vm1501_vm6, %v2189_v12 }
0x2d23   :  { %v2266_v55 = vpop.f32.mrb[52].mxu0 }
0x2d24   :  { %v2267_v45 = vadd.f32 %v2363_v48, %v2266_v55  ;;  %v2615_v24 = vpop.f32.mrb[53].mxu0 }
0x2d25   :  { %v2269_v27 = vpop.f32.mrb[54].mxu0 }
0x2d26   :  { %2272 = vst.msk [vmem:[#allocation10] sm:$0xff] %vm131_vm2, %v2267_v45  ;;  %v2616_v28 = vpop.f32.mrb[55].mxu0 }
0x2d27   :  { %2937 = shalt.err (!%p2934_p0)
}
0x2d28   :  { %s2938_s10 = scalar_lea.hbm %s3692_s11, 128 }
0x2d29   :  { %p2939_p1 = scmp.ne.s32.totalorder %s3692_s11, %s2938_s10  ;;  %p2942_p2 = scmp.lt.u32.totalorder %s2938_s10, %s3692_s11 }
0x2d2b   :  { %p2944_p3 = pnand %p2942_p2, %p2939_p1 }
0x2d2d   :  { %2947 = shalt.err (!%p2944_p3)
}
0x2d2e   :  { %2282 = dma.vmem_to_hbm [thread:$0]  %s2280_s16, 128, %s3692_s11, [#allocation6]  }
0x2d2f   :  { %2952 = dma.done.wait [#allocation6], 128  }
0x2d30   :  { %2953 = vsyncadd [#allocation6], 4294967168 }
0x2d31   :  { %2286 = vsyncpa [#allocation5], 1 }
0x2d32   :  { %2287 = vsyncpa [#allocation8], 1 }
0x2d33   :  { %2288 = vsyncpa [#allocation6], 1 }

</bundles_post_ra>
